<compile_context>
chip_gen: v7x
topology: tpu7x:2x2x1
jax: 0.10.0
libtpu: 0.0.40
codegen_flags: <defaults>
</compile_context>

<pallas_src>
import functools

import numpy as np
import jax
import jax.numpy as jnp
from jax.experimental import pallas as pl
from jax.experimental.pallas import tpu as pltpu


# ------------------------------- utilities ----------------------------------

_VMEM = pl.BlockSpec(memory_space=pltpu.MemorySpace.VMEM)
_GRIDLESS_MAX_ROWS = 512  # below this, run one whole-slab invocation


def _round_up(x, m):
    return (x + m - 1) // m * m


def _vmem_budget_bytes():
    """Scoped-VMEM budget derived from the actual chip (v7x: 64 MiB -> ~28 MiB)."""
    try:
        info = pltpu.get_tpu_info()
        cap = int(getattr(info, "vmem_capacity_bytes", 0))
        if cap > 0:
            return max(16 << 20, min(int(cap * 0.45), 96 << 20))
    except Exception:
        pass
    return 32 << 20


def _pick_block_m(bytes_per_row, budget):
    """Largest 128-multiple row tile whose double-buffered slabs fit ~half the budget."""
    bm = (budget // 2) // max(2 * bytes_per_row, 1)
    bm = max(256, min(2048, int(bm)))
    return (bm // 128) * 128


# ----------------------------- Pallas kernels --------------------------------

def _enc_pool_small_kernel(t_ref, w_ref, b_ref, o_ref, *, m):
    """Fused Conv(k,k taps folded in K) + bias + ReLU + 2x2 MaxPool.

    t (4*m, K) bf16: the 4 pool quadrants stacked along rows -> ONE MXU GEMM,
    quadrant max taken with static sublane slices on the f32 accumulator
    (max/+b/ReLU commute with the reference order conv+b -> ReLU -> pool).
    """
    acc = jnp.dot(t_ref[...], w_ref[...], preferred_element_type=jnp.float32)
    acc = jnp.maximum(jnp.maximum(acc[0:m], acc[m:2 * m]),
                      jnp.maximum(acc[2 * m:3 * m], acc[3 * m:4 * m]))
    o_ref[...] = jnp.maximum(acc + b_ref[...], 0.0).astype(o_ref.dtype)


def _enc_pool_grid_kernel(t_ref, w_ref, b_ref, o_ref):
    """Row-tiled variant for large batch: t (4, bm, K), weights/bias resident."""
    w = w_ref[...]
    acc = jnp.dot(t_ref[0], w, preferred_element_type=jnp.float32)
    for q in range(1, 4):
        acc = jnp.maximum(
            acc, jnp.dot(t_ref[q], w, preferred_element_type=jnp.float32))
    o_ref[...] = jnp.maximum(acc + b_ref[...], 0.0).astype(o_ref.dtype)


def _decoder_kernel(t_ref, w1_ref, b1_ref, w2_ref, b2_ref, w3_ref, b3_ref,
                    o_ref):
    """Entire decoder fused: three chained phase-packed GEMMs.

    dec1 (ConvT k3 s2) as a 2x2-tap GEMM with 4 output phases packed on lanes,
    dec2/dec3 (ConvT k2 s2, per-pixel maps) as block-diagonal GEMMs applied to
    every packed phase-pixel.  bias + ReLU / Sigmoid fused; MXU operands bf16,
    accumulation f32.  Sigmoid = 0.5*tanh(0.5*x)+0.5 (one EUP op, bounded).
    """
    h = jnp.dot(t_ref[...], w1_ref[...], preferred_element_type=jnp.float32)
    h = jnp.maximum(h + b1_ref[...], 0.0).astype(jnp.bfloat16)
    h = jnp.dot(h, w2_ref[...], preferred_element_type=jnp.float32)
    h = jnp.maximum(h + b2_ref[...], 0.0).astype(jnp.bfloat16)
    h = jnp.dot(h, w3_ref[...], preferred_element_type=jnp.float32)
    h = h + b3_ref[...]
    o_ref[...] = (0.5 * jnp.tanh(0.5 * h) + 0.5).astype(o_ref.dtype)


# ------------------------------ encoder stage --------------------------------

def enc_stage(x, w_gemm, b2d, *, k=3, pad=1):
    """Conv2d(k, stride 1, padding=pad) + ReLU + MaxPool2d(2,2): one pallas_call."""
    N, H, W, C = x.shape
    Cout = w_gemm.shape[-1]
    xp = jnp.pad(x, ((0, 0), (pad, pad), (pad, pad), (0, 0)))
    Ho, Wo = H + 2 * pad - k + 1, W + 2 * pad - k + 1
    Hp2, Wp2 = Ho // 2, Wo // 2                       # floor-mode pool
    KK = k * k * C
    Mp = N * Hp2 * Wp2

    # Build taps directly per pool quadrant (no intermediate full-taps slab).
    # Quadrant (py,px), tap (ky,kx): xp[:, py+ky::2, px+kx::2, :], col order (ky,kx,ci).
    quads = []
    for py in range(2):
        for px in range(2):
            slabs = [xp[:, py + ky: py + ky + 2 * Hp2: 2,
                        px + kx: px + kx + 2 * Wp2: 2, :]
                     for ky in range(k) for kx in range(k)]
            quads.append(jnp.concatenate(slabs, axis=-1).reshape(Mp, KK))

    wq = w_gemm.astype(jnp.bfloat16)
    budget = _vmem_budget_bytes()

    if Mp <= _GRIDLESS_MAX_ROWS:
        m_pad = _round_up(Mp, 8)
        quads = [jnp.pad(q, ((0, m_pad - Mp), (0, 0))) for q in quads]
        taps2d = jnp.concatenate(quads, axis=0).astype(jnp.bfloat16)  # (4*m_pad, KK)
        y = pl.pallas_call(
            functools.partial(_enc_pool_small_kernel, m=m_pad),
            out_shape=jax.ShapeDtypeStruct((m_pad, Cout), jnp.bfloat16),
            in_specs=[_VMEM, _VMEM, _VMEM], out_specs=_VMEM,
        )(taps2d, wq, b2d)
    else:
        bm = _pick_block_m(4 * KK * 2 + Cout * 2, budget)
        bm = min(bm, max(256, _round_up((Mp + 1) // 2, 128)))  # >=2 grid steps
        m_pad = _round_up(Mp, bm)
        quads = [jnp.pad(q, ((0, m_pad - Mp), (0, 0))) for q in quads]
        taps4 = jnp.stack(quads, axis=0).astype(jnp.bfloat16)        # (4, m_pad, KK)
        y = pl.pallas_call(
            _enc_pool_grid_kernel,
            out_shape=jax.ShapeDtypeStruct((m_pad, Cout), jnp.bfloat16),
            grid_spec=pltpu.PrefetchScalarGridSpec(
                num_scalar_prefetch=0, grid=(m_pad // bm,),
                in_specs=[pl.BlockSpec((4, bm, KK), lambda i: (0, i, 0)),
                          pl.BlockSpec((KK, Cout), lambda i: (0, 0)),
                          pl.BlockSpec((1, Cout), lambda i: (0, 0))],
                out_specs=pl.BlockSpec((bm, Cout), lambda i: (i, 0))),
            compiler_params=pltpu.CompilerParams(
                dimension_semantics=("parallel",),
                vmem_limit_bytes=budget),
        )(taps4, wq, b2d)

    return y[:Mp].reshape(N, Hp2, Wp2, Cout)


# --------------------------- fused decoder stage ------------------------------

def decoder_forward(z, dec_params):
    """ConvT(3,s2)+ReLU -> ConvT(2,s2)+ReLU -> ConvT(2,s2)+Sigmoid, one kernel."""
    (w1, b1), (w2, b2), (w3, b3) = dec_params
    N, H, W, C = z.shape
    K1 = 4 * C
    Cout_last = w3.shape[-1]                       # (p1,p2,p3,co) = 64

    # dec1 2x2 taps of the pad-1 latent, one row per dec1 "quad" pixel (n,qy,qx).
    zp = jnp.pad(z, ((0, 0), (1, 1), (1, 1), (0, 0)))
    Hq, Wq = H + 1, W + 1
    taps = jnp.concatenate(
        [zp[:, dy:dy + Hq, dx:dx + Wq, :] for dy in range(2) for dx in range(2)],
        axis=-1)
    M = N * Hq * Wq
    taps2d = taps.reshape(M, K1).astype(jnp.bfloat16)
    budget = _vmem_budget_bytes()

    if M <= _GRIDLESS_MAX_ROWS:
        m_pad = _round_up(M, 8)
        taps2d = jnp.pad(taps2d, ((0, m_pad - M), (0, 0)))
        y = pl.pallas_call(
            _decoder_kernel,
            out_shape=jax.ShapeDtypeStruct((m_pad, Cout_last), jnp.float32),
            in_specs=[_VMEM] * 7, out_specs=_VMEM,
        )(taps2d, w1, b1, w2, b2, w3, b3)
    else:
        bm = _pick_block_m(K1 * 2 + Cout_last * 4, budget)
        bm = min(bm, max(256, _round_up((M + 1) // 2, 128)))
        m_pad = _round_up(M, bm)
        taps2d = jnp.pad(taps2d, ((0, m_pad - M), (0, 0)))
        y = pl.pallas_call(
            _decoder_kernel,
            out_shape=jax.ShapeDtypeStruct((m_pad, Cout_last), jnp.float32),
            grid_spec=pltpu.PrefetchScalarGridSpec(
                num_scalar_prefetch=0, grid=(m_pad // bm,),
                in_specs=[pl.BlockSpec((bm, K1), lambda i: (i, 0)),
                          pl.BlockSpec(w1.shape, lambda i: (0, 0)),
                          pl.BlockSpec(b1.shape, lambda i: (0, 0)),
                          pl.BlockSpec(w2.shape, lambda i: (0, 0)),
                          pl.BlockSpec(b2.shape, lambda i: (0, 0)),
                          pl.BlockSpec(w3.shape, lambda i: (0, 0)),
                          pl.BlockSpec(b3.shape, lambda i: (0, 0))],
                out_specs=pl.BlockSpec((bm, Cout_last), lambda i: (i, 0))),
            compiler_params=pltpu.CompilerParams(
                dimension_semantics=("parallel",),
                vmem_limit_bytes=budget),
        )(taps2d, w1, b1, w2, b2, w3, b3)

    # Single pixel-shuffle assembly + crop (cols ordered (p1y,p1x,p2y,p2x,p3y,p3x)).
    y = y[:M].reshape(N, Hq, Wq, 2, 2, 2, 2, 2, 2)
    y = jnp.transpose(y, (0, 1, 3, 5, 7, 2, 4, 6, 8))
    y = y.reshape(N, 8 * Hq, 8 * Wq, 1)
    return y[:, :8 * H + 4, :8 * W + 4, :]          # crop invalid dec1 border phase


# --------------------- PyTorch-layout weight conversion -----------------------

def _conv_to_gemm(w_pt, b):
    """Conv2d (Cout,Cin,K,K) -> (K*K*Cin, Cout) bf16, tap row order (ky,kx,ci)."""
    Cout, Cin, K, _ = w_pt.shape
    wg = jnp.transpose(w_pt, (2, 3, 1, 0)).reshape(K * K * Cin, Cout)
    return wg.astype(jnp.bfloat16), b.reshape(1, Cout).astype(jnp.float32)


def _convT_k3s2_to_gemm(w_pt, b):
    """ConvTranspose2d(k=3,s=2) (Cin,Cout,3,3) -> (4*Cin, 4*Cout).

    Rows: 2x2-tap (dy,dx,ci) of the pad-1 input; cols: output phases (py,px,co).
    Tap used = kmap(parity, offset); absent -> 0."""
    Cin, Cout = int(w_pt.shape[0]), int(w_pt.shape[1])
    kmap = {(0, 0): 2, (0, 1): 0, (1, 1): 1}
    w_np = np.asarray(w_pt, np.float32)
    wb = np.zeros((4 * Cin, 4 * Cout), np.float32)
    for dy in range(2):
        for dx in range(2):
            for py in range(2):
                for px in range(2):
                    ky = kmap.get((py, dy))
                    kx = kmap.get((px, dx))
                    if ky is None or kx is None:
                        continue
                    r = (2 * dy + dx) * Cin
                    c = (2 * py + px) * Cout
                    wb[r:r + Cin, c:c + Cout] = w_np[:, :, ky, kx]
    return jnp.asarray(wb, jnp.bfloat16), jnp.tile(b, 4).astype(jnp.float32)


def _convT_k2s2_base(w_pt):
    """ConvTranspose2d(k=2,s=2) (Cin,Cout,2,2) -> per-pixel map (Cin, 4*Cout), cols (py,px,co)."""
    Cin, Cout = int(w_pt.shape[0]), int(w_pt.shape[1])
    return np.transpose(np.asarray(w_pt, np.float32), (0, 2, 3, 1)).reshape(Cin, 4 * Cout)


def _block_diag(w_base, reps):
    kin, kout = w_base.shape
    out = np.zeros((reps * kin, reps * kout), np.float32)
    for r in range(reps):
        out[r * kin:(r + 1) * kin, r * kout:(r + 1) * kout] = w_base
    return out


def _decoder_params(dec1, dec2, dec3):
    (w1_pt, b1_pt), (w2_pt, b2_pt), (w3_pt, b3_pt) = dec1, dec2, dec3
    w1, b1 = _convT_k3s2_to_gemm(w1_pt, b1_pt)                       # (256,128)
    w2 = jnp.asarray(_block_diag(_convT_k2s2_base(w2_pt), 4), jnp.bfloat16)   # (128,256)
    b2 = jnp.tile(jnp.asarray(b2_pt, jnp.float32), 16)                        # (256,)
    w3 = jnp.asarray(_block_diag(_convT_k2s2_base(w3_pt), 16), jnp.bfloat16)  # (256,64)
    b3 = jnp.tile(jnp.asarray(b3_pt, jnp.float32), 64)                        # (64,)
    return ((w1, b1.reshape(1, -1)), (w2, b2.reshape(1, -1)),
            (w3, b3.reshape(1, -1)))


# ---------------------------- parameters / model ------------------------------

def init_params(key):
    """Synthetic PyTorch-like init; returns (pallas GEMM-layout params, pt-layout params)."""
    ks = jax.random.split(key, 12)

    def u(k_, shape, fan_in):
        bound = 1.0 / np.sqrt(fan_in)
        return jax.random.uniform(k_, shape, jnp.float32, -bound, bound)

    pt = {
        "enc": [(u(ks[0], (16, 1, 3, 3), 9),      u(ks[1], (16,), 9)),
                (u(ks[2], (32, 16, 3, 3), 144),   u(ks[3], (32,), 144)),
                (u(ks[4], (64, 32, 3, 3), 288),   u(ks[5], (64,), 288))],
        "dec": [(u(ks[6], (64, 32, 3, 3), 288),   u(ks[7], (32,), 288)),
                (u(ks[8], (32, 16, 2, 2), 64),    u(ks[9], (16,), 64)),
                (u(ks[10], (16, 1, 2, 2), 4),     u(ks[11], (1,), 4))],
    }
    pallas = {
        "enc1": _conv_to_gemm(*pt["enc"][0]),
        "enc2": _conv_to_gemm(*pt["enc"][1]),
        "enc3": _conv_to_gemm(*pt["enc"][2]),
        "dec": _decoder_params(*pt["dec"]),
    }
    return pallas, pt


def autoencoder_forward(params, x_nchw):
    x = jnp.transpose(x_nchw, (0, 2, 3, 1)).astype(jnp.bfloat16)  # NHWC, bf16 MXU operands
    x = enc_stage(x, *params["enc1"])       # (N, 14, 14, 16)
    x = enc_stage(x, *params["enc2"])       # (N,  7,  7, 32)
    x = enc_stage(x, *params["enc3"])       # (N,  3,  3, 64)
    y = decoder_forward(x, params["dec"])   # (N, 28, 28,  1) f32
    return jnp.transpose(y, (0, 3, 1, 2))   # NCHW


# ------------------------- pure-f32 JAX reference -----------------------------

def _ref_forward(params_pt, x_nchw):
    x = jnp.transpose(x_nchw, (0, 2, 3, 1)).astype(jnp.float32)

    def conv(x, w, b, pad):
        rhs = jnp.transpose(w, (2, 3, 1, 0)).astype(jnp.float32)      # HWIO
        y = jax.lax.conv_general_dilated(
            x, rhs, window_strides=(1, 1), padding=[(pad, pad), (pad, pad)],
            dimension_numbers=('NHWC', 'HWIO', 'NHWC'))
        return y + b.astype(jnp.float32)

    def convT(x, w, b, k, s):
        rhs = jnp.transpose(w, (2, 3, 0, 1))[::-1, ::-1, :, :].astype(jnp.float32)
        y = jax.lax.conv_general_dilated(
            x, rhs, window_strides=(1, 1), padding=[(k - 1, k - 1)] * 2,
            lhs_dilation=(s, s), dimension_numbers=('NHWC', 'HWIO', 'NHWC'))
        return y + b.astype(jnp.float32)

    def pool(x):
        return jax.lax.reduce_window(x, -jnp.inf, jax.lax.max,
                                     (1, 2, 2, 1), (1, 2, 2, 1), 'VALID')

    (e1w, e1b), (e2w, e2b), (e3w, e3b) = params_pt["enc"]
    (d1w, d1b), (d2w, d2b), (d3w, d3b) = params_pt["dec"]
    x = pool(jax.nn.relu(conv(x, e1w, e1b, 1)))
    x = pool(jax.nn.relu(conv(x, e2w, e2b, 1)))
    x = pool(jax.nn.relu(conv(x, e3w, e3b, 1)))
    x = jax.nn.relu(convT(x, d1w, d1b, 3, 2))
    x = jax.nn.relu(convT(x, d2w, d2b, 2, 2))
    x = jax.nn.sigmoid(convT(x, d3w, d3b, 2, 2))
    return jnp.transpose(x, (0, 3, 1, 2))


# ----------------------------------- main -------------------------------------

if __name__ == "__main__":
    key = jax.random.PRNGKey(0)
    kp, kx = jax.random.split(key)
    params, params_pt = init_params(kp)

    # MNIST-like input implied by the architecture: (N=2, C=1, H=W=28).
    x = jax.random.normal(kx, (2, 1, 28, 28), jnp.float32)

    fwd = jax.jit(functools.partial(autoencoder_forward, params))
    y = fwd(x)
    jax.block_until_ready(y)

    assert y.shape == (2, 1, 28, 28), y.shape
    y_np = np.asarray(y, np.float32)
    assert np.all(np.isfinite(y_np))
    assert np.all((y_np > -1e-3) & (y_np < 1.0 + 1e-3))   # bounded sigmoid

    # Validate against a pure-f32 XLA conv reference (bf16 MXU operands -> drift).
    y_ref = np.asarray(jax.jit(functools.partial(_ref_forward, params_pt))(x),
                       np.float32)
    max_err = float(np.max(np.abs(y_np - y_ref)))
    assert max_err < 8e-2, max_err

    print("KERNEL_OK")
</pallas_src>

<mosaic_0001>
module attributes {stable_mosaic.version = 11 : i64} {
  func.func @_enc_pool_small_kernel(%arg0: memref<1568x9xbf16, #tpu.memory_space<vmem>>, %arg1: memref<9x16xbf16, #tpu.memory_space<vmem>>, %arg2: memref<1x16xf32, #tpu.memory_space<vmem>>, %arg3: memref<392x16xbf16, #tpu.memory_space<vmem>>) attributes {dimension_semantics = [], scalar_prefetch = 0 : i64, scratch_operands = 0 : i64, tpu.core_type = #tpu.core_type<tc>} {
    %c0 = arith.constant 0 : index
    %c0_0 = arith.constant 0 : index
    %0 = vector.load %arg0[%c0, %c0_0] : memref<1568x9xbf16, #tpu.memory_space<vmem>>, vector<1568x9xbf16>
    %c0_1 = arith.constant 0 : index
    %c0_2 = arith.constant 0 : index
    %1 = vector.load %arg1[%c0_1, %c0_2] : memref<9x16xbf16, #tpu.memory_space<vmem>>, vector<9x16xbf16>
    %cst = arith.constant dense<0.000000e+00> : vector<1568x16xf32>
    %2 = tpu.matmul %0, %1, %cst {dimension_numbers = #tpu.dot_dimension_numbers<[1], [0], [0], [1], [0, 0, 1, 1], [], []>} : vector<1568x9xbf16>, vector<9x16xbf16>, vector<1568x16xf32> -> vector<1568x16xf32>
    %3 = vector.extract_strided_slice %2 {offsets = [0, 0], sizes = [392, 16], strides = [1, 1]} : vector<1568x16xf32> to vector<392x16xf32>
    %4 = vector.extract_strided_slice %2 {offsets = [392, 0], sizes = [392, 16], strides = [1, 1]} : vector<1568x16xf32> to vector<392x16xf32>
    %5 = arith.maximumf %3, %4 : vector<392x16xf32>
    %6 = vector.extract_strided_slice %2 {offsets = [784, 0], sizes = [392, 16], strides = [1, 1]} : vector<1568x16xf32> to vector<392x16xf32>
    %7 = vector.extract_strided_slice %2 {offsets = [1176, 0], sizes = [392, 16], strides = [1, 1]} : vector<1568x16xf32> to vector<392x16xf32>
    %8 = arith.maximumf %6, %7 : vector<392x16xf32>
    %9 = arith.maximumf %5, %8 : vector<392x16xf32>
    %c0_3 = arith.constant 0 : index
    %c0_4 = arith.constant 0 : index
    %10 = vector.load %arg2[%c0_3, %c0_4] : memref<1x16xf32, #tpu.memory_space<vmem>>, vector<1x16xf32>
    %11 = vector.broadcast %10 : vector<1x16xf32> to vector<392x16xf32>
    %12 = arith.addf %9, %11 : vector<392x16xf32>
    %cst_5 = arith.constant 0.000000e+00 : f32
    %13 = vector.broadcast %cst_5 : f32 to vector<392x16xf32>
    %14 = arith.maximumf %12, %13 : vector<392x16xf32>
    %15 = arith.truncf %14 : vector<392x16xf32> to vector<392x16xbf16>
    %c0_6 = arith.constant 0 : index
    %c0_7 = arith.constant 0 : index
    %16 = vector.load %arg3[%c0_6, %c0_7] : memref<392x16xbf16, #tpu.memory_space<vmem>>, vector<392x16xbf16>
    tpu.vector_store %arg3[%c0_6, %c0_7], %15 {strides = array<i32>} : memref<392x16xbf16, #tpu.memory_space<vmem>>, vector<392x16xbf16>,
    return
  }
}

module attributes {stable_mosaic.version = 11 : i64} {
  func.func @_enc_pool_small_kernel(%arg0: memref<416x144xbf16, #tpu.memory_space<vmem>>, %arg1: memref<144x32xbf16, #tpu.memory_space<vmem>>, %arg2: memref<1x32xf32, #tpu.memory_space<vmem>>, %arg3: memref<104x32xbf16, #tpu.memory_space<vmem>>) attributes {dimension_semantics = [], scalar_prefetch = 0 : i64, scratch_operands = 0 : i64, tpu.core_type = #tpu.core_type<tc>} {
    %c0 = arith.constant 0 : index
    %c0_0 = arith.constant 0 : index
    %0 = vector.load %arg0[%c0, %c0_0] : memref<416x144xbf16, #tpu.memory_space<vmem>>, vector<416x144xbf16>
    %c0_1 = arith.constant 0 : index
    %c0_2 = arith.constant 0 : index
    %1 = vector.load %arg1[%c0_1, %c0_2] : memref<144x32xbf16, #tpu.memory_space<vmem>>, vector<144x32xbf16>
    %cst = arith.constant dense<0.000000e+00> : vector<416x32xf32>
    %2 = tpu.matmul %0, %1, %cst {dimension_numbers = #tpu.dot_dimension_numbers<[1], [0], [0], [1], [0, 0, 1, 1], [], []>} : vector<416x144xbf16>, vector<144x32xbf16>, vector<416x32xf32> -> vector<416x32xf32>
    %3 = vector.extract_strided_slice %2 {offsets = [0, 0], sizes = [104, 32], strides = [1, 1]} : vector<416x32xf32> to vector<104x32xf32>
    %4 = vector.extract_strided_slice %2 {offsets = [104, 0], sizes = [104, 32], strides = [1, 1]} : vector<416x32xf32> to vector<104x32xf32>
    %5 = arith.maximumf %3, %4 : vector<104x32xf32>
    %6 = vector.extract_strided_slice %2 {offsets = [208, 0], sizes = [104, 32], strides = [1, 1]} : vector<416x32xf32> to vector<104x32xf32>
    %7 = vector.extract_strided_slice %2 {offsets = [312, 0], sizes = [104, 32], strides = [1, 1]} : vector<416x32xf32> to vector<104x32xf32>
    %8 = arith.maximumf %6, %7 : vector<104x32xf32>
    %9 = arith.maximumf %5, %8 : vector<104x32xf32>
    %c0_3 = arith.constant 0 : index
    %c0_4 = arith.constant 0 : index
    %10 = vector.load %arg2[%c0_3, %c0_4] : memref<1x32xf32, #tpu.memory_space<vmem>>, vector<1x32xf32>
    %11 = vector.broadcast %10 : vector<1x32xf32> to vector<104x32xf32>
    %12 = arith.addf %9, %11 : vector<104x32xf32>
    %cst_5 = arith.constant 0.000000e+00 : f32
    %13 = vector.broadcast %cst_5 : f32 to vector<104x32xf32>
    %14 = arith.maximumf %12, %13 : vector<104x32xf32>
    %15 = arith.truncf %14 : vector<104x32xf32> to vector<104x32xbf16>
    %c0_6 = arith.constant 0 : index
    %c0_7 = arith.constant 0 : index
    %16 = vector.load %arg3[%c0_6, %c0_7] : memref<104x32xbf16, #tpu.memory_space<vmem>>, vector<104x32xbf16>
    tpu.vector_store %arg3[%c0_6, %c0_7], %15 {strides = array<i32>} : memref<104x32xbf16, #tpu.memory_space<vmem>>, vector<104x32xbf16>,
    return
  }
}

module attributes {stable_mosaic.version = 11 : i64} {
  func.func @_enc_pool_small_kernel(%arg0: memref<96x288xbf16, #tpu.memory_space<vmem>>, %arg1: memref<288x64xbf16, #tpu.memory_space<vmem>>, %arg2: memref<1x64xf32, #tpu.memory_space<vmem>>, %arg3: memref<24x64xbf16, #tpu.memory_space<vmem>>) attributes {dimension_semantics = [], scalar_prefetch = 0 : i64, scratch_operands = 0 : i64, tpu.core_type = #tpu.core_type<tc>} {
    %c0 = arith.constant 0 : index
    %c0_0 = arith.constant 0 : index
    %0 = vector.load %arg0[%c0, %c0_0] : memref<96x288xbf16, #tpu.memory_space<vmem>>, vector<96x288xbf16>
    %c0_1 = arith.constant 0 : index
    %c0_2 = arith.constant 0 : index
    %1 = vector.load %arg1[%c0_1, %c0_2] : memref<288x64xbf16, #tpu.memory_space<vmem>>, vector<288x64xbf16>
    %cst = arith.constant dense<0.000000e+00> : vector<96x64xf32>
    %2 = tpu.matmul %0, %1, %cst {dimension_numbers = #tpu.dot_dimension_numbers<[1], [0], [0], [1], [0, 0, 1, 1], [], []>} : vector<96x288xbf16>, vector<288x64xbf16>, vector<96x64xf32> -> vector<96x64xf32>
    %3 = vector.extract_strided_slice %2 {offsets = [0, 0], sizes = [24, 64], strides = [1, 1]} : vector<96x64xf32> to vector<24x64xf32>
    %4 = vector.extract_strided_slice %2 {offsets = [24, 0], sizes = [24, 64], strides = [1, 1]} : vector<96x64xf32> to vector<24x64xf32>
    %5 = arith.maximumf %3, %4 : vector<24x64xf32>
    %6 = vector.extract_strided_slice %2 {offsets = [48, 0], sizes = [24, 64], strides = [1, 1]} : vector<96x64xf32> to vector<24x64xf32>
    %7 = vector.extract_strided_slice %2 {offsets = [72, 0], sizes = [24, 64], strides = [1, 1]} : vector<96x64xf32> to vector<24x64xf32>
    %8 = arith.maximumf %6, %7 : vector<24x64xf32>
    %9 = arith.maximumf %5, %8 : vector<24x64xf32>
    %c0_3 = arith.constant 0 : index
    %c0_4 = arith.constant 0 : index
    %10 = vector.load %arg2[%c0_3, %c0_4] : memref<1x64xf32, #tpu.memory_space<vmem>>, vector<1x64xf32>
    %11 = vector.broadcast %10 : vector<1x64xf32> to vector<24x64xf32>
    %12 = arith.addf %9, %11 : vector<24x64xf32>
    %cst_5 = arith.constant 0.000000e+00 : f32
    %13 = vector.broadcast %cst_5 : f32 to vector<24x64xf32>
    %14 = arith.maximumf %12, %13 : vector<24x64xf32>
    %15 = arith.truncf %14 : vector<24x64xf32> to vector<24x64xbf16>
    %c0_6 = arith.constant 0 : index
    %c0_7 = arith.constant 0 : index
    %16 = vector.load %arg3[%c0_6, %c0_7] : memref<24x64xbf16, #tpu.memory_space<vmem>>, vector<24x64xbf16>
    tpu.vector_store %arg3[%c0_6, %c0_7], %15 {strides = array<i32>} : memref<24x64xbf16, #tpu.memory_space<vmem>>, vector<24x64xbf16>,
    return
  }
}

module attributes {stable_mosaic.version = 11 : i64} {
  func.func @_decoder_kernel(%arg0: memref<32x256xbf16, #tpu.memory_space<vmem>>, %arg1: memref<256x128xbf16, #tpu.memory_space<vmem>>, %arg2: memref<1x128xf32, #tpu.memory_space<vmem>>, %arg3: memref<128x256xbf16, #tpu.memory_space<vmem>>, %arg4: memref<1x256xf32, #tpu.memory_space<vmem>>, %arg5: memref<256x64xbf16, #tpu.memory_space<vmem>>, %arg6: memref<1x64xf32, #tpu.memory_space<vmem>>, %arg7: memref<32x64xf32, #tpu.memory_space<vmem>>) attributes {dimension_semantics = [], scalar_prefetch = 0 : i64, scratch_operands = 0 : i64, tpu.core_type = #tpu.core_type<tc>} {
    %c0 = arith.constant 0 : index
    %c0_0 = arith.constant 0 : index
    %0 = vector.load %arg0[%c0, %c0_0] : memref<32x256xbf16, #tpu.memory_space<vmem>>, vector<32x256xbf16>
    %c0_1 = arith.constant 0 : index
    %c0_2 = arith.constant 0 : index
    %1 = vector.load %arg1[%c0_1, %c0_2] : memref<256x128xbf16, #tpu.memory_space<vmem>>, vector<256x128xbf16>
    %cst = arith.constant dense<0.000000e+00> : vector<32x128xf32>
    %2 = tpu.matmul %0, %1, %cst {dimension_numbers = #tpu.dot_dimension_numbers<[1], [0], [0], [1], [0, 0, 1, 1], [], []>} : vector<32x256xbf16>, vector<256x128xbf16>, vector<32x128xf32> -> vector<32x128xf32>
    %c0_3 = arith.constant 0 : index
    %c0_4 = arith.constant 0 : index
    %3 = vector.load %arg2[%c0_3, %c0_4] : memref<1x128xf32, #tpu.memory_space<vmem>>, vector<1x128xf32>
    %4 = vector.broadcast %3 : vector<1x128xf32> to vector<32x128xf32>
    %5 = arith.addf %2, %4 : vector<32x128xf32>
    %cst_5 = arith.constant 0.000000e+00 : f32
    %6 = vector.broadcast %cst_5 : f32 to vector<32x128xf32>
    %7 = arith.maximumf %5, %6 : vector<32x128xf32>
    %8 = arith.truncf %7 : vector<32x128xf32> to vector<32x128xbf16>
    %c0_6 = arith.constant 0 : index
    %c0_7 = arith.constant 0 : index
    %9 = vector.load %arg3[%c0_6, %c0_7] : memref<128x256xbf16, #tpu.memory_space<vmem>>, vector<128x256xbf16>
    %cst_8 = arith.constant dense<0.000000e+00> : vector<32x256xf32>
    %10 = tpu.matmul %8, %9, %cst_8 {dimension_numbers = #tpu.dot_dimension_numbers<[1], [0], [0], [1], [0, 0, 1, 1], [], []>} : vector<32x128xbf16>, vector<128x256xbf16>, vector<32x256xf32> -> vector<32x256xf32>
    %c0_9 = arith.constant 0 : index
    %c0_10 = arith.constant 0 : index
    %11 = vector.load %arg4[%c0_9, %c0_10] : memref<1x256xf32, #tpu.memory_space<vmem>>, vector<1x256xf32>
    %12 = vector.broadcast %11 : vector<1x256xf32> to vector<32x256xf32>
    %13 = arith.addf %10, %12 : vector<32x256xf32>
    %cst_11 = arith.constant 0.000000e+00 : f32
    %14 = vector.broadcast %cst_11 : f32 to vector<32x256xf32>
    %15 = arith.maximumf %13, %14 : vector<32x256xf32>
    %16 = arith.truncf %15 : vector<32x256xf32> to vector<32x256xbf16>
    %c0_12 = arith.constant 0 : index
    %c0_13 = arith.constant 0 : index
    %17 = vector.load %arg5[%c0_12, %c0_13] : memref<256x64xbf16, #tpu.memory_space<vmem>>, vector<256x64xbf16>
    %cst_14 = arith.constant dense<0.000000e+00> : vector<32x64xf32>
    %18 = tpu.matmul %16, %17, %cst_14 {dimension_numbers = #tpu.dot_dimension_numbers<[1], [0], [0], [1], [0, 0, 1, 1], [], []>} : vector<32x256xbf16>, vector<256x64xbf16>, vector<32x64xf32> -> vector<32x64xf32>
    %c0_15 = arith.constant 0 : index
    %c0_16 = arith.constant 0 : index
    %19 = vector.load %arg6[%c0_15, %c0_16] : memref<1x64xf32, #tpu.memory_space<vmem>>, vector<1x64xf32>
    %20 = vector.broadcast %19 : vector<1x64xf32> to vector<32x64xf32>
    %21 = arith.addf %18, %20 : vector<32x64xf32>
    %cst_17 = arith.constant 5.000000e-01 : f32
    %22 = vector.broadcast %cst_17 : f32 to vector<32x64xf32>
    %23 = arith.mulf %22, %21 : vector<32x64xf32>
    %24 = math.tanh %23 : vector<32x64xf32>
    %cst_18 = arith.constant 5.000000e-01 : f32
    %25 = vector.broadcast %cst_18 : f32 to vector<32x64xf32>
    %26 = arith.mulf %25, %24 : vector<32x64xf32>
    %cst_19 = arith.constant 5.000000e-01 : f32
    %27 = vector.broadcast %cst_19 : f32 to vector<32x64xf32>
    %28 = arith.addf %26, %27 : vector<32x64xf32>
    %c0_20 = arith.constant 0 : index
    %c0_21 = arith.constant 0 : index
    %29 = vector.load %arg7[%c0_20, %c0_21] : memref<32x64xf32, #tpu.memory_space<vmem>>, vector<32x64xf32>
    tpu.vector_store %arg7[%c0_20, %c0_21], %28 {strides = array<i32>} : memref<32x64xf32, #tpu.memory_space<vmem>>, vector<32x64xf32>,
    return
  }
}

</mosaic_0001>

<bundles_post_ra>
// kernel: autoencoder_forward.4
= control target key start
LH: loop header
LB: loop body
LE: loop exit
PB: predicated region body
PF: predicated region fallthrough
CT: control target
= control target key end

     0   :  { %vm1003_vm0 = vcmask 1043456   ;;  %vm1004_vm1 = vcmask 1044480   ;;  %vm708_vm2 = vcmask 72704   ;;  %v3025_v1 = vmov 65535   ;;  %s3997_s1 = inlined_call_operand.vmem [shape: bf16[9,16], index: 1, kind: input, shape index: {}]   ;;  %s3998_s0 = inlined_call_operand.vmem [shape: bf16[1568,9], index: 0, kind: input, shape index: {}]   ;;  %s3999_s2 = inlined_call_operand.vmem [shape: f32[1,16], index: 2, kind: input, shape index: {}]   ;;  %s4000_s3 = inlined_call_operand.vmem [shape: bf16[392,16], index: 3, kind: output, shape index: {}]  }
   0x1   :  { %v2926_v0 = vld [vmem:[%s3997_s1] sm:$0x1f]   ;;  %v1005_v2 = vsel %vm1003_vm0, 4294967295, %v3025_v1  ;;  %v2928_v5 = vld [vmem:[%s3998_s0 + $0x190] sm:$0xff]   ;;  %v2929_v7 = vld [vmem:[%s3998_s0 + $0x8] sm:$0xff]   ;;  %vm2276_vm3 = vcmask 125952  }
   0x2   :  { %v2927_v3 = vld [vmem:[%s3998_s0] sm:$0xff]   ;;  %v1006_v4 = vsel %vm1004_vm1, %v1005_v2, 0  ;;  %2827 = vmatprep.mubr.msk.bf16.mxu1 %vm708_vm2, %v2928_v5  ;;  %v2930_v8 = vld [vmem:[%s3998_s0 + $0x198] sm:$0xff]   ;;  %v2931_v9 = vld [vmem:[%s3998_s0 + $0x10] sm:$0xff]  }
   0x3   :  { %v1008_v6 = vand.u32 %v2926_v0, %v1006_v4  ;;  %2727 = vmatprep.mubr.msk.bf16.mxu0 %vm708_vm2, %v2927_v3  ;;  %v2932_v10 = vld [vmem:[%s3998_s0 + $0x1a0] sm:$0xff]   ;;  %v2933_v11 = vld [vmem:[%s3998_s0 + $0x18] sm:$0xff]   ;;  %v2934_v12 = vld [vmem:[%s3998_s0 + $0x1a8] sm:$0xff]  }
   0x4   :  { %v2935_v13 = vld [vmem:[%s3998_s0 + $0x20] sm:$0xff]   ;;  %v2936_v14 = vld [vmem:[%s3998_s0 + $0x1b0] sm:$0xff]   ;;  %v2937_v15 = vld [vmem:[%s3998_s0 + $0x28] sm:$0xff]  }
   0x5   :  { %2725 = vmatprep.subr.bf16.mxu0 %v1008_v6  ;;  %2923 = vmatprep.subr.bf16.mxu1 %v1008_v6  ;;  %v2938_v16 = vld [vmem:[%s3998_s0 + $0x1b8] sm:$0xff]   ;;  %v2939_v17 = vld [vmem:[%s3998_s0 + $0x30] sm:$0xff]   ;;  %v2940_v18 = vld [vmem:[%s3998_s0 + $0x1c0] sm:$0xff]  }
   0x6   :  { %2726 = vmatpush3.bf16.msra.mxu0 %v1008_v6  ;;  %2924 = vmatpush3.bf16.msra.mxu1 %v1008_v6  ;;  %v2941_v19 = vld [vmem:[%s3998_s0 + $0x38] sm:$0xff]   ;;  %v2942_v20 = vld [vmem:[%s3998_s0 + $0x1c8] sm:$0xff]   ;;  %v2943_v21 = vld [vmem:[%s3998_s0 + $0x40] sm:$0xff]  }
   0x7   :  { %v2944_v22 = vld [vmem:[%s3998_s0 + $0x1d0] sm:$0xff]   ;;  %v2945_v23 = vld [vmem:[%s3998_s0 + $0x48] sm:$0xff]   ;;  %v2946_v24 = vld [vmem:[%s3998_s0 + $0x1d8] sm:$0xff]  }
   0x8   :  { %v2947_v25 = vld [vmem:[%s3998_s0 + $0x50] sm:$0xff]   ;;  %v2948_v26 = vld [vmem:[%s3998_s0 + $0x1e0] sm:$0xff]   ;;  %v2949_v27 = vld [vmem:[%s3998_s0 + $0x58] sm:$0xff]  }
   0x9   :  { %2728 = vmatmul.mubr.msk.bf16.vlgmr.msra.gmra.mrb[0].mxu0 %vm708_vm2, %v2929_v7  ;;  %2828 = vmatmul.mubr.msk.bf16.vlgmr.msra.gmra.mrb[0].mxu1 %vm708_vm2, %v2930_v8  ;;  %v2950_v28 = vld [vmem:[%s3998_s0 + $0x1e8] sm:$0xff]   ;;  %v2951_v29 = vld [vmem:[%s3998_s0 + $0x60] sm:$0xff]   ;;  %v2952_v30 = vld [vmem:[%s3998_s0 + $0x1f0] sm:$0xff]  }
   0xa   :  { %2731 = vmatprep.mubr.msk.bf16.mxu0 %vm708_vm2, %v2931_v9  ;;  %2831 = vmatprep.mubr.msk.bf16.mxu1 %vm708_vm2, %v2932_v10  ;;  %v2953_v31 = vld [vmem:[%s3998_s0 + $0x68] sm:$0xff]   ;;  %v2954_v32 = vld [vmem:[%s3998_s0 + $0x1f8] sm:$0xff]   ;;  %v2955_v33 = vld [vmem:[%s3998_s0 + $0x70] sm:$0xff]  }
   0xb   :  { %v2956_v34 = vld [vmem:[%s3998_s0 + $0x200] sm:$0xff]   ;;  %v2957_v35 = vld [vmem:[%s3998_s0 + $0x78] sm:$0xff]   ;;  %v2958_v36 = vld [vmem:[%s3998_s0 + $0x208] sm:$0xff]  }
   0xc   :  { %v2959_v37 = vld [vmem:[%s3998_s0 + $0x80] sm:$0xff]   ;;  %v2960_v38 = vld [vmem:[%s3998_s0 + $0x210] sm:$0xff]   ;;  %v2961_v39 = vld [vmem:[%s3998_s0 + $0x88] sm:$0xff]  }
   0xd   :  { %v2962_v40 = vld [vmem:[%s3998_s0 + $0x218] sm:$0xff]   ;;  %v2963_v41 = vld [vmem:[%s3998_s0 + $0x90] sm:$0xff]   ;;  %v2964_v42 = vld [vmem:[%s3998_s0 + $0x220] sm:$0xff]  }
   0xe   :  { %v2965_v43 = vld [vmem:[%s3998_s0 + $0x98] sm:$0xff]   ;;  %v2966_v44 = vld [vmem:[%s3998_s0 + $0x228] sm:$0xff]   ;;  %v2967_v45 = vld [vmem:[%s3998_s0 + $0xa0] sm:$0xff]  }
   0xf   :  { %v2968_v46 = vld [vmem:[%s3998_s0 + $0x230] sm:$0xff]   ;;  %v2969_v47 = vld [vmem:[%s3998_s0 + $0xa8] sm:$0xff]   ;;  %v2970_v48 = vld [vmem:[%s3998_s0 + $0x238] sm:$0xff]  }
  0x10   :  { %v2971_v49 = vld [vmem:[%s3998_s0 + $0xb0] sm:$0xff]   ;;  %v2972_v50 = vld [vmem:[%s3998_s0 + $0x240] sm:$0xff]   ;;  %v2973_v51 = vld [vmem:[%s3998_s0 + $0xb8] sm:$0xff]  }
  0x11   :  { %2732 = vmatmul.mubr.msk.bf16.gmra.mrb[4].mxu0 %vm708_vm2, %v2933_v11  ;;  %2832 = vmatmul.mubr.msk.bf16.gmra.mrb[4].mxu1 %vm708_vm2, %v2934_v12  ;;  %v2974_v52 = vld [vmem:[%s3998_s0 + $0x248] sm:$0xff]   ;;  %v2975_v53 = vld [vmem:[%s3998_s0 + $0xc0] sm:$0xff]   ;;  %v2976_v54 = vld [vmem:[%s3998_s0 + $0x250] sm:$0xff]  }
  0x12   :  { %2735 = vmatprep.mubr.msk.bf16.mxu0 %vm708_vm2, %v2935_v13  ;;  %2835 = vmatprep.mubr.msk.bf16.mxu1 %vm708_vm2, %v2936_v14  ;;  %v2977_v55 = vld [vmem:[%s3998_s0 + $0xc8] sm:$0xff]   ;;  %v2978_v56 = vld [vmem:[%s3998_s0 + $0x258] sm:$0xff]   ;;  %v2979_v57 = vld [vmem:[%s3998_s0 + $0xd0] sm:$0xff]  }
  0x13   :  { %v2980_v58 = vld [vmem:[%s3998_s0 + $0x260] sm:$0xff]   ;;  %v2981_v59 = vld [vmem:[%s3998_s0 + $0xd8] sm:$0xff]   ;;  %v2982_v60 = vld [vmem:[%s3998_s0 + $0x268] sm:$0xff]  }
  0x14   :  { %v2983_v61 = vld [vmem:[%s3998_s0 + $0xe0] sm:$0xff]   ;;  %v2984_v62 = vld [vmem:[%s3998_s0 + $0x270] sm:$0xff]   ;;  %v2985_v63 = vld [vmem:[%s3998_s0 + $0xe8] sm:$0xff]  }
  0x15   :  { %v2986_v0 = vld [vmem:[%s3998_s0 + $0x278] sm:$0xff]   ;;  %v2987_v1 = vld [vmem:[%s3998_s0 + $0xf0] sm:$0xff]   ;;  %v2988_v2 = vld [vmem:[%s3998_s0 + $0x280] sm:$0xff]  }
  0x16   :  { %v2989_v3 = vld [vmem:[%s3998_s0 + $0xf8] sm:$0xff]   ;;  %v2990_v4 = vld [vmem:[%s3998_s0 + $0x288] sm:$0xff]   ;;  %v2991_v5 = vld [vmem:[%s3998_s0 + $0x100] sm:$0xff]  }
  0x17   :  { %v2992_v6 = vld [vmem:[%s3998_s0 + $0x290] sm:$0xff]   ;;  %v2993_v7 = vld [vmem:[%s3998_s0 + $0x108] sm:$0xff]   ;;  %v2994_v8 = vld [vmem:[%s3998_s0 + $0x298] sm:$0xff]  }
  0x18   :  { %v2995_v9 = vld [vmem:[%s3998_s0 + $0x110] sm:$0xff]   ;;  %v2996_v10 = vld [vmem:[%s3998_s0 + $0x2a0] sm:$0xff]   ;;  %v2997_v11 = vld [vmem:[%s3998_s0 + $0x118] sm:$0xff]  }
  0x19   :  { %2736 = vmatmul.mubr.msk.bf16.gmra.mrb[8].mxu0 %vm708_vm2, %v2937_v15  ;;  %2836 = vmatmul.mubr.msk.bf16.gmra.mrb[8].mxu1 %vm708_vm2, %v2938_v16  ;;  %v2998_v12 = vld [vmem:[%s3998_s0 + $0x2a8] sm:$0xff]   ;;  %v2999_v13 = vld [vmem:[%s3998_s0 + $0x120] sm:$0xff]   ;;  %v3000_v14 = vld [vmem:[%s3998_s0 + $0x2b0] sm:$0xff]  }
  0x1a   :  { %2739 = vmatprep.mubr.msk.bf16.mxu0 %vm708_vm2, %v2939_v17  ;;  %2839 = vmatprep.mubr.msk.bf16.mxu1 %vm708_vm2, %v2940_v18  ;;  %v3001_v15 = vld [vmem:[%s3998_s0 + $0x128] sm:$0xff]   ;;  %v3002_v16 = vld [vmem:[%s3998_s0 + $0x2b8] sm:$0xff]   ;;  %v3003_v17 = vld [vmem:[%s3998_s0 + $0x130] sm:$0xff]  }
  0x1b   :  { %v3004_v18 = vld [vmem:[%s3998_s0 + $0x2c0] sm:$0xff]  }
  0x21   :  { %2740 = vmatmul.mubr.msk.bf16.gmra.mrb[12].mxu0 %vm708_vm2, %v2941_v19  ;;  %2840 = vmatmul.mubr.msk.bf16.gmra.mrb[12].mxu1 %vm708_vm2, %v2942_v20  ;;  %v3005_v19 = vld [vmem:[%s3998_s0 + $0x138] sm:$0xff]   ;;  %v3006_v20 = vld [vmem:[%s3998_s0 + $0x2c8] sm:$0xff]  }
  0x22   :  { %2743 = vmatprep.mubr.msk.bf16.mxu0 %vm708_vm2, %v2943_v21  ;;  %2843 = vmatprep.mubr.msk.bf16.mxu1 %vm708_vm2, %v2944_v22  ;;  %v3007_v21 = vld [vmem:[%s3998_s0 + $0x140] sm:$0xff]   ;;  %v3008_v22 = vld [vmem:[%s3998_s0 + $0x2d0] sm:$0xff]  }
  0x29   :  { %2744 = vmatmul.mubr.msk.bf16.gmra.mrb[16].mxu0 %vm708_vm2, %v2945_v23  ;;  %2844 = vmatmul.mubr.msk.bf16.gmra.mrb[16].mxu1 %vm708_vm2, %v2946_v24  ;;  %v3009_v23 = vld [vmem:[%s3998_s0 + $0x148] sm:$0xff]   ;;  %v3010_v24 = vld [vmem:[%s3998_s0 + $0x2d8] sm:$0xff]  }
  0x2a   :  { %2747 = vmatprep.mubr.msk.bf16.mxu0 %vm708_vm2, %v2947_v25  ;;  %2847 = vmatprep.mubr.msk.bf16.mxu1 %vm708_vm2, %v2948_v26  ;;  %v3011_v25 = vld [vmem:[%s3998_s0 + $0x150] sm:$0xff]   ;;  %v3012_v26 = vld [vmem:[%s3998_s0 + $0x2e0] sm:$0xff]  }
  0x31   :  { %2748 = vmatmul.mubr.msk.bf16.gmra.mrb[20].mxu0 %vm708_vm2, %v2949_v27  ;;  %2848 = vmatmul.mubr.msk.bf16.gmra.mrb[20].mxu1 %vm708_vm2, %v2950_v28  ;;  %v3013_v27 = vld [vmem:[%s3998_s0 + $0x158] sm:$0xff]   ;;  %v3014_v28 = vld [vmem:[%s3998_s0 + $0x2e8] sm:$0xff]  }
  0x32   :  { %2751 = vmatprep.mubr.msk.bf16.mxu0 %vm708_vm2, %v2951_v29  ;;  %2851 = vmatprep.mubr.msk.bf16.mxu1 %vm708_vm2, %v2952_v30  ;;  %v3015_v29 = vld [vmem:[%s3998_s0 + $0x160] sm:$0xff]   ;;  %v3016_v30 = vld [vmem:[%s3998_s0 + $0x2f0] sm:$0xff]  }
  0x39   :  { %2752 = vmatmul.mubr.msk.bf16.gmra.mrb[24].mxu0 %vm708_vm2, %v2953_v31  ;;  %2852 = vmatmul.mubr.msk.bf16.gmra.mrb[24].mxu1 %vm708_vm2, %v2954_v32  ;;  %v3017_v31 = vld [vmem:[%s3998_s0 + $0x168] sm:$0xff]   ;;  %v3018_v32 = vld [vmem:[%s3998_s0 + $0x2f8] sm:$0xff]  }
  0x3a   :  { %2755 = vmatprep.mubr.msk.bf16.mxu0 %vm708_vm2, %v2955_v33  ;;  %2855 = vmatprep.mubr.msk.bf16.mxu1 %vm708_vm2, %v2956_v34  ;;  %v3019_v33 = vld [vmem:[%s3998_s0 + $0x170] sm:$0xff]   ;;  %v3020_v34 = vld [vmem:[%s3998_s0 + $0x300] sm:$0xff]  }
  0x41   :  { %2756 = vmatmul.mubr.msk.bf16.gmra.mrb[28].mxu0 %vm708_vm2, %v2957_v35  ;;  %2856 = vmatmul.mubr.msk.bf16.gmra.mrb[28].mxu1 %vm708_vm2, %v2958_v36  ;;  %v3021_v35 = vld [vmem:[%s3998_s0 + $0x178] sm:$0xff]   ;;  %v3022_v36 = vld [vmem:[%s3998_s0 + $0x308] sm:$0xff]  }
  0x42   :  { %2759 = vmatprep.mubr.msk.bf16.mxu0 %vm708_vm2, %v2959_v37  ;;  %2859 = vmatprep.mubr.msk.bf16.mxu1 %vm708_vm2, %v2960_v38  ;;  %v3023_v37 = vld [vmem:[%s3998_s0 + $0x180] sm:$0xff]   ;;  %v3024_v38 = vld [vmem:[%s3998_s0 + $0x188] sm:$0xff]  }
  0x49   :  { %2760 = vmatmul.mubr.msk.bf16.gmra.mrb[32].mxu0 %vm708_vm2, %v2961_v39  ;;  %2860 = vmatmul.mubr.msk.bf16.gmra.mrb[32].mxu1 %vm708_vm2, %v2962_v40 }
  0x4a   :  { %2763 = vmatprep.mubr.msk.bf16.mxu0 %vm708_vm2, %v2963_v41  ;;  %2863 = vmatprep.mubr.msk.bf16.mxu1 %vm708_vm2, %v2964_v42 }
  0x51   :  { %2764 = vmatmul.mubr.msk.bf16.gmra.mrb[36].mxu0 %vm708_vm2, %v2965_v43  ;;  %2864 = vmatmul.mubr.msk.bf16.gmra.mrb[36].mxu1 %vm708_vm2, %v2966_v44 }
  0x52   :  { %2767 = vmatprep.mubr.msk.bf16.mxu0 %vm708_vm2, %v2967_v45  ;;  %2867 = vmatprep.mubr.msk.bf16.mxu1 %vm708_vm2, %v2968_v46 }
  0x59   :  { %2768 = vmatmul.mubr.msk.bf16.gmra.mrb[40].mxu0 %vm708_vm2, %v2969_v47  ;;  %2868 = vmatmul.mubr.msk.bf16.gmra.mrb[40].mxu1 %vm708_vm2, %v2970_v48 }
  0x5a   :  { %2771 = vmatprep.mubr.msk.bf16.mxu0 %vm708_vm2, %v2971_v49  ;;  %2871 = vmatprep.mubr.msk.bf16.mxu1 %vm708_vm2, %v2972_v50 }
  0x61   :  { %2772 = vmatmul.mubr.msk.bf16.gmra.mrb[44].mxu0 %vm708_vm2, %v2973_v51  ;;  %2872 = vmatmul.mubr.msk.bf16.gmra.mrb[44].mxu1 %vm708_vm2, %v2974_v52 }
  0x62   :  { %2775 = vmatprep.mubr.msk.bf16.mxu0 %vm708_vm2, %v2975_v53  ;;  %2875 = vmatprep.mubr.msk.bf16.mxu1 %vm708_vm2, %v2976_v54 }
  0x69   :  { %2776 = vmatmul.mubr.msk.bf16.gmra.mrb[48].mxu0 %vm708_vm2, %v2977_v55  ;;  %2876 = vmatmul.mubr.msk.bf16.gmra.mrb[48].mxu1 %vm708_vm2, %v2978_v56 }
  0x6a   :  { %2779 = vmatprep.mubr.msk.bf16.mxu0 %vm708_vm2, %v2979_v57  ;;  %2879 = vmatprep.mubr.msk.bf16.mxu1 %vm708_vm2, %v2980_v58 }
  0x71   :  { %2780 = vmatmul.mubr.msk.bf16.gmra.mrb[52].mxu0 %vm708_vm2, %v2981_v59  ;;  %2880 = vmatmul.mubr.msk.bf16.gmra.mrb[52].mxu1 %vm708_vm2, %v2982_v60 }
  0x72   :  { %2783 = vmatprep.mubr.msk.bf16.mxu0 %vm708_vm2, %v2983_v61  ;;  %2883 = vmatprep.mubr.msk.bf16.mxu1 %vm708_vm2, %v2984_v62 }
  0x79   :  { %2784 = vmatmul.mubr.msk.bf16.gmra.mrb[56].mxu0 %vm708_vm2, %v2985_v63  ;;  %2884 = vmatmul.mubr.msk.bf16.gmra.mrb[56].mxu1 %vm708_vm2, %v2986_v0 }
  0x7a   :  { %2787 = vmatprep.mubr.msk.bf16.mxu0 %vm708_vm2, %v2987_v1  ;;  %2887 = vmatprep.mubr.msk.bf16.mxu1 %vm708_vm2, %v2988_v2 }
  0x81   :  { %2788 = vmatmul.mubr.msk.bf16.gmra.mrb[60].mxu0 %vm708_vm2, %v2989_v3  ;;  %2888 = vmatmul.mubr.msk.bf16.gmra.mrb[60].mxu1 %vm708_vm2, %v2990_v4 }
  0x82   :  { %2791 = vmatprep.mubr.msk.bf16.mxu0 %vm708_vm2, %v2991_v5  ;;  %2891 = vmatprep.mubr.msk.bf16.mxu1 %vm708_vm2, %v2992_v6 }
  0x89   :  { %2792 = vmatmul.mubr.msk.bf16.gmra.mrb[64].mxu0 %vm708_vm2, %v2993_v7  ;;  %2892 = vmatmul.mubr.msk.bf16.gmra.mrb[64].mxu1 %vm708_vm2, %v2994_v8 }
  0x8a   :  { %2795 = vmatprep.mubr.msk.bf16.mxu0 %vm708_vm2, %v2995_v9  ;;  %2895 = vmatprep.mubr.msk.bf16.mxu1 %vm708_vm2, %v2996_v10 }
  0x91   :  { %2796 = vmatmul.mubr.msk.bf16.gmra.mrb[68].mxu0 %vm708_vm2, %v2997_v11  ;;  %2896 = vmatmul.mubr.msk.bf16.gmra.mrb[68].mxu1 %vm708_vm2, %v2998_v12 }
  0x92   :  { %2799 = vmatprep.mubr.msk.bf16.mxu0 %vm708_vm2, %v2999_v13  ;;  %2899 = vmatprep.mubr.msk.bf16.mxu1 %vm708_vm2, %v3000_v14 }
  0x99   :  { %2800 = vmatmul.mubr.msk.bf16.gmra.mrb[72].mxu0 %vm708_vm2, %v3001_v15  ;;  %2900 = vmatmul.mubr.msk.bf16.gmra.mrb[72].mxu1 %vm708_vm2, %v3002_v16 }
  0x9a   :  { %2803 = vmatprep.mubr.msk.bf16.mxu0 %vm708_vm2, %v3003_v17  ;;  %2903 = vmatprep.mubr.msk.bf16.mxu1 %vm708_vm2, %v3004_v18 }
  0xa1   :  { %2804 = vmatmul.mubr.msk.bf16.gmra.mrb[76].mxu0 %vm708_vm2, %v3005_v19  ;;  %2904 = vmatmul.mubr.msk.bf16.gmra.mrb[76].mxu1 %vm708_vm2, %v3006_v20 }
  0xa2   :  { %2807 = vmatprep.mubr.msk.bf16.mxu0 %vm708_vm2, %v3007_v21  ;;  %2907 = vmatprep.mubr.msk.bf16.mxu1 %vm708_vm2, %v3008_v22 }
  0xa9   :  { %2808 = vmatmul.mubr.msk.bf16.gmra.mrb[80].mxu0 %vm708_vm2, %v3009_v23  ;;  %2908 = vmatmul.mubr.msk.bf16.gmra.mrb[80].mxu1 %vm708_vm2, %v3010_v24 }
  0xaa   :  { %2811 = vmatprep.mubr.msk.bf16.mxu0 %vm708_vm2, %v3011_v25  ;;  %2911 = vmatprep.mubr.msk.bf16.mxu1 %vm708_vm2, %v3012_v26 }
  0xb1   :  { %2812 = vmatmul.mubr.msk.bf16.gmra.mrb[84].mxu0 %vm708_vm2, %v3013_v27  ;;  %2912 = vmatmul.mubr.msk.bf16.gmra.mrb[84].mxu1 %vm708_vm2, %v3014_v28 }
  0xb2   :  { %2815 = vmatprep.mubr.msk.bf16.mxu0 %vm708_vm2, %v3015_v29  ;;  %2915 = vmatprep.mubr.msk.bf16.mxu1 %vm708_vm2, %v3016_v30 }
  0xb9   :  { %2816 = vmatmul.mubr.msk.bf16.gmra.mrb[88].mxu0 %vm708_vm2, %v3017_v31  ;;  %2916 = vmatmul.mubr.msk.bf16.gmra.mrb[88].mxu1 %vm708_vm2, %v3018_v32 }
  0xba   :  { %2819 = vmatprep.mubr.msk.bf16.mxu0 %vm708_vm2, %v3019_v33  ;;  %2919 = vmatprep.mubr.msk.bf16.mxu1 %vm708_vm2, %v3020_v34 }
  0xc1   :  { %2820 = vmatmul.mubr.msk.bf16.gmra.mrb[92].mxu0 %vm708_vm2, %v3021_v35  ;;  %2920 = vmatmul.mubr.msk.bf16.gmra.mrb[92].mxu1 %vm708_vm2, %v3022_v36 }
  0xc2   :  { %2823 = vmatprep.mubr.msk.bf16.mxu0 %vm708_vm2, %v3023_v37 }
  0xc9   :  { %2824 = vmatmul.mubr.msk.bf16.gmra.mrb[96].mxu0 %vm708_vm2, %v3024_v38 }
  0xdc   :  { %v3441_v39 = vpop.f32.mrb[0].mxu0  ;;  %v3443_v40 = vpop.f32.mrb[0].mxu1 }
  0xdd   :  { %v3445_v41 = vpop.f32.mrb[1].mxu0  ;;  %v3447_v42 = vpop.f32.mrb[1].mxu1 }
  0xde   :  { %4005 = vst [vmem:[#allocation2_spill] sm:$0xff] %v3445_v41  ;;  %v3449_v43 = vpop.f32.mrb[2].mxu0  ;;  %v3451_v44 = vpop.f32.mrb[2].mxu1 }
  0xdf   :  { %v3453_v45 = vpop.f32.mrb[3].mxu0  ;;  %v3455_v46 = vpop.f32.mrb[3].mxu1 }
  0xe0   :  { %4006 = vst [vmem:[#allocation3_spill] sm:$0xff] %v3453_v45 }
  0xe4   :  { %v3457_v47 = vpop.f32.mrb[4].mxu0  ;;  %v3459_v48 = vpop.f32.mrb[4].mxu1 }
  0xe5   :  { %v3461_v49 = vpop.f32.mrb[5].mxu0  ;;  %v3463_v50 = vpop.f32.mrb[5].mxu1 }
  0xe6   :  { %v3465_v51 = vpop.f32.mrb[6].mxu0  ;;  %v3467_v52 = vpop.f32.mrb[6].mxu1 }
  0xe7   :  { %v3469_v53 = vpop.f32.mrb[7].mxu0  ;;  %v3471_v54 = vpop.f32.mrb[7].mxu1 }
  0xec   :  { %v3473_v55 = vpop.f32.mrb[8].mxu0  ;;  %v3475_v56 = vpop.f32.mrb[8].mxu1 }
  0xed   :  { %v3477_v57 = vpop.f32.mrb[9].mxu0  ;;  %v3479_v58 = vpop.f32.mrb[9].mxu1 }
  0xee   :  { %v3481_v59 = vpop.f32.mrb[10].mxu0  ;;  %v3483_v60 = vpop.f32.mrb[10].mxu1 }
  0xef   :  { %v3485_v61 = vpop.f32.mrb[11].mxu0  ;;  %v3487_v62 = vpop.f32.mrb[11].mxu1 }
  0xf4   :  { %v3489_v63 = vpop.f32.mrb[12].mxu0  ;;  %v3491_v0 = vpop.f32.mrb[12].mxu1 }
  0xf5   :  { %v3493_v1 = vpop.f32.mrb[13].mxu0  ;;  %v3495_v2 = vpop.f32.mrb[13].mxu1 }
  0xf6   :  { %v3497_v3 = vpop.f32.mrb[14].mxu0  ;;  %v3499_v4 = vpop.f32.mrb[14].mxu1 }
  0xf7   :  { %v3501_v5 = vpop.f32.mrb[15].mxu0  ;;  %v3503_v6 = vpop.f32.mrb[15].mxu1 }
  0xfc   :  { %v3505_v7 = vpop.f32.mrb[16].mxu0  ;;  %v3507_v8 = vpop.f32.mrb[16].mxu1 }
  0xfd   :  { %v3509_v9 = vpop.f32.mrb[17].mxu0  ;;  %v3511_v10 = vpop.f32.mrb[17].mxu1 }
  0xfe   :  { %v3513_v11 = vpop.f32.mrb[18].mxu0  ;;  %v3515_v12 = vpop.f32.mrb[18].mxu1 }
  0xff   :  { %v3517_v13 = vpop.f32.mrb[19].mxu0  ;;  %v3519_v14 = vpop.f32.mrb[19].mxu1 }
 0x104   :  { %v3521_v15 = vpop.f32.mrb[20].mxu0  ;;  %v3523_v16 = vpop.f32.mrb[20].mxu1 }
 0x105   :  { %v3525_v17 = vpop.f32.mrb[21].mxu0  ;;  %v3527_v18 = vpop.f32.mrb[21].mxu1 }
 0x106   :  { %v3529_v19 = vpop.f32.mrb[22].mxu0  ;;  %v3531_v20 = vpop.f32.mrb[22].mxu1 }
 0x107   :  { %v3533_v21 = vpop.f32.mrb[23].mxu0  ;;  %v3535_v22 = vpop.f32.mrb[23].mxu1 }
 0x10c   :  { %v3537_v23 = vpop.f32.mrb[24].mxu0  ;;  %v3539_v24 = vpop.f32.mrb[24].mxu1 }
 0x10d   :  { %4007 = vst [vmem:[#allocation4_spill] sm:$0xff] %v3537_v23  ;;  %4008 = vst [vmem:[#allocation5_spill] sm:$0xff] %v3539_v24  ;;  %v3541_v25 = vpop.f32.mrb[25].mxu0  ;;  %v3543_v26 = vpop.f32.mrb[25].mxu1 }
 0x10e   :  { %4009 = vst [vmem:[#allocation6_spill] sm:$0xff] %v3541_v25  ;;  %4010 = vst [vmem:[#allocation7_spill] sm:$0xff] %v3543_v26  ;;  %v3545_v27 = vpop.f32.mrb[26].mxu0  ;;  %v3547_v28 = vpop.f32.mrb[26].mxu1 }
 0x10f   :  { %4011 = vst [vmem:[#allocation8_spill] sm:$0xff] %v3545_v27  ;;  %4012 = vst [vmem:[#allocation9_spill] sm:$0xff] %v3547_v28  ;;  %v3549_v29 = vpop.f32.mrb[27].mxu0  ;;  %v3551_v30 = vpop.f32.mrb[27].mxu1 }
 0x114   :  { %v3553_v31 = vpop.f32.mrb[28].mxu0  ;;  %v3555_v32 = vpop.f32.mrb[28].mxu1 }
 0x115   :  { %4013 = vst [vmem:[#allocation10_spill] sm:$0xff] %v3553_v31  ;;  %4014 = vst [vmem:[#allocation11_spill] sm:$0xff] %v3555_v32  ;;  %v3557_v33 = vpop.f32.mrb[29].mxu0  ;;  %v3559_v34 = vpop.f32.mrb[29].mxu1 }
 0x116   :  { %4015 = vst [vmem:[#allocation12_spill] sm:$0xff] %v3557_v33  ;;  %4016 = vst [vmem:[#allocation13_spill] sm:$0xff] %v3559_v34  ;;  %v3561_v35 = vpop.f32.mrb[30].mxu0  ;;  %v3563_v36 = vpop.f32.mrb[30].mxu1 }
 0x117   :  { %4017 = vst [vmem:[#allocation14_spill] sm:$0xff] %v3561_v35  ;;  %4018 = vst [vmem:[#allocation15_spill] sm:$0xff] %v3563_v36  ;;  %v3565_v37 = vpop.f32.mrb[31].mxu0  ;;  %v3567_v38 = vpop.f32.mrb[31].mxu1 }
 0x118   :  { %4019 = vst [vmem:[#allocation16_spill] sm:$0xff] %v3565_v37  ;;  %4020 = vst [vmem:[#allocation17_spill] sm:$0xff] %v3567_v38 }
 0x11c   :  { %v3569_v28 = vpop.f32.mrb[32].mxu0  ;;  %v3571_v27 = vpop.f32.mrb[32].mxu1 }
 0x11d   :  { %4021 = vst [vmem:[#allocation18_spill] sm:$0xff] %v3569_v28  ;;  %4022 = vst [vmem:[#allocation19_spill] sm:$0xff] %v3571_v27  ;;  %v3573_v26 = vpop.f32.mrb[33].mxu0  ;;  %v3575_v31 = vpop.f32.mrb[33].mxu1 }
 0x11e   :  { %4023 = vst [vmem:[#allocation20_spill] sm:$0xff] %v3573_v26  ;;  %4024 = vst [vmem:[#allocation21_spill] sm:$0xff] %v3575_v31  ;;  %v3577_v32 = vpop.f32.mrb[34].mxu0  ;;  %v3579_v33 = vpop.f32.mrb[34].mxu1 }
 0x11f   :  { %4025 = vst [vmem:[#allocation22_spill] sm:$0xff] %v3577_v32  ;;  %4026 = vst [vmem:[#allocation23_spill] sm:$0xff] %v3579_v33  ;;  %v3581_v34 = vpop.f32.mrb[35].mxu0  ;;  %v3583_v35 = vpop.f32.mrb[35].mxu1 }
 0x120   :  { %4027 = vst [vmem:[#allocation24_spill] sm:$0xff] %v3581_v34  ;;  %4028 = vst [vmem:[#allocation25_spill] sm:$0xff] %v3583_v35 }
 0x124   :  { %v3585_v36 = vpop.f32.mrb[36].mxu0  ;;  %v3587_v37 = vpop.f32.mrb[36].mxu1 }
 0x125   :  { %4029 = vst [vmem:[#allocation26_spill] sm:$0xff] %v3585_v36  ;;  %4030 = vst [vmem:[#allocation27_spill] sm:$0xff] %v3587_v37  ;;  %v3589_v38 = vpop.f32.mrb[37].mxu0  ;;  %v3591_v28 = vpop.f32.mrb[37].mxu1 }
 0x126   :  { %4031 = vst [vmem:[#allocation28_spill] sm:$0xff] %v3589_v38  ;;  %4032 = vst [vmem:[#allocation29_spill] sm:$0xff] %v3591_v28  ;;  %v3593_v27 = vpop.f32.mrb[38].mxu0  ;;  %v3595_v26 = vpop.f32.mrb[38].mxu1 }
 0x127   :  { %4033 = vst [vmem:[#allocation30_spill] sm:$0xff] %v3593_v27  ;;  %4034 = vst [vmem:[#allocation31_spill] sm:$0xff] %v3595_v26  ;;  %v3597_v31 = vpop.f32.mrb[39].mxu0  ;;  %v3599_v32 = vpop.f32.mrb[39].mxu1 }
 0x128   :  { %4035 = vst [vmem:[#allocation32_spill] sm:$0xff] %v3597_v31  ;;  %4036 = vst [vmem:[#allocation33_spill] sm:$0xff] %v3599_v32 }
 0x12c   :  { %v3601_v33 = vpop.f32.mrb[40].mxu0  ;;  %v3603_v34 = vpop.f32.mrb[40].mxu1 }
 0x12d   :  { %4037 = vst [vmem:[#allocation34_spill] sm:$0xff] %v3601_v33  ;;  %4038 = vst [vmem:[#allocation35_spill] sm:$0xff] %v3603_v34  ;;  %v3605_v35 = vpop.f32.mrb[41].mxu0  ;;  %v3607_v36 = vpop.f32.mrb[41].mxu1 }
 0x12e   :  { %4039 = vst [vmem:[#allocation36_spill] sm:$0xff] %v3605_v35  ;;  %4040 = vst [vmem:[#allocation37_spill] sm:$0xff] %v3607_v36  ;;  %v3609_v37 = vpop.f32.mrb[42].mxu0  ;;  %v3611_v38 = vpop.f32.mrb[42].mxu1 }
 0x12f   :  { %4041 = vst [vmem:[#allocation38_spill] sm:$0xff] %v3609_v37  ;;  %4042 = vst [vmem:[#allocation39_spill] sm:$0xff] %v3611_v38  ;;  %v3613_v28 = vpop.f32.mrb[43].mxu0  ;;  %v3615_v27 = vpop.f32.mrb[43].mxu1 }
 0x130   :  { %4043 = vst [vmem:[#allocation40_spill] sm:$0xff] %v3613_v28  ;;  %4044 = vst [vmem:[#allocation41_spill] sm:$0xff] %v3615_v27 }
 0x134   :  { %v3617_v26 = vpop.f32.mrb[44].mxu0  ;;  %v3619_v31 = vpop.f32.mrb[44].mxu1 }
 0x135   :  { %4045 = vst [vmem:[#allocation42_spill] sm:$0xff] %v3617_v26  ;;  %4046 = vst [vmem:[#allocation43_spill] sm:$0xff] %v3619_v31  ;;  %v3621_v32 = vpop.f32.mrb[45].mxu0  ;;  %v3623_v33 = vpop.f32.mrb[45].mxu1 }
 0x136   :  { %4047 = vst [vmem:[#allocation44_spill] sm:$0xff] %v3621_v32  ;;  %4048 = vst [vmem:[#allocation45_spill] sm:$0xff] %v3623_v33  ;;  %v3625_v34 = vpop.f32.mrb[46].mxu0  ;;  %v3627_v35 = vpop.f32.mrb[46].mxu1 }
 0x137   :  { %4049 = vst [vmem:[#allocation46_spill] sm:$0xff] %v3625_v34  ;;  %4050 = vst [vmem:[#allocation47_spill] sm:$0xff] %v3627_v35  ;;  %v3629_v36 = vpop.f32.mrb[47].mxu0  ;;  %v3631_v37 = vpop.f32.mrb[47].mxu1 }
 0x138   :  { %4051 = vst [vmem:[#allocation48_spill] sm:$0xff] %v3629_v36  ;;  %4052 = vst [vmem:[#allocation49_spill] sm:$0xff] %v3631_v37 }
 0x13c   :  { %v3633_v38 = vpop.f32.mrb[48].mxu0  ;;  %v2877_v28 = vpop.f32.mrb[48].mxu1 }
 0x13d   :  { %4053 = vst [vmem:[#allocation50_spill] sm:$0xff] %v3633_v38  ;;  %v1879_v31 = vmax.f32 %v3455_v46, %v2877_v28  ;;  %v3638_v27 = vpop.f32.mrb[49].mxu0  ;;  %v3640_v32 = vpop.f32.mrb[49].mxu1  ;;  %v3652_v46 = vld [vmem:[%s3999_s2] ss:$0 sm:$0xff] }
 0x13e   :  { %4054 = vst [vmem:[#allocation51_spill] sm:$0xff] %v3638_v27  ;;  %4055 = vst [vmem:[#allocation52_spill] sm:$0xff] %v3640_v32  ;;  %v2778_v33 = vpop.f32.mrb[50].mxu0  ;;  %v2878_v34 = vpop.f32.mrb[50].mxu1 }
 0x13f   :  { %v1829_v35 = vmax.f32 %v3441_v39, %v2778_v33  ;;  %v1880_v36 = vmax.f32 %v3443_v40, %v2878_v34  ;;  %v3644_v25 = vpop.f32.mrb[51].mxu0  ;;  %v1639_v37 = vpop.f32.mrb[51].mxu1 }
 0x140   :  { %4056 = vst [vmem:[#allocation53_spill] sm:$0xff] %v3644_v25  ;;  %v1878_v26 = vmax.f32 %v3447_v42, %v1639_v37 }
 0x142   :  { %v1927_v28 = vmax.f32 %v1829_v35, %v1878_v26 }
 0x144   :  { %v1983_v38 = vadd.f32 %v3652_v46, %v1927_v28  ;;  %v2781_v45 = vpop.f32.mrb[52].mxu0  ;;  %v2881_v39 = vpop.f32.mrb[52].mxu1 }
 0x145   :  { %v1832_v40 = vmax.f32 %v3469_v53, %v2781_v45  ;;  %v1883_v33 = vmax.f32 %v3471_v54, %v2881_v39  ;;  %v1252_v34 = vpop.f32.mrb[53].mxu0  ;;  %v1652_v27 = vpop.f32.mrb[53].mxu1 }
 0x146   :  { %v2032_v32 = vmax.f32 %v1983_v38, 0.0  ;;  %v1830_v24 = vmax.f32 %v3449_v43, %v1252_v34  ;;  %v1881_v42 = vmax.f32 %v3451_v44, %v1652_v27  ;;  %v2782_v37 = vpop.f32.mrb[54].mxu0  ;;  %v2882_v25 = vpop.f32.mrb[54].mxu1 }
 0x147   :  { %v1833_v26 = vmax.f32 %v3457_v47, %v2782_v37  ;;  %v1884_v35 = vmax.f32 %v3459_v48, %v2882_v25  ;;  %v1255_v28 = vpop.f32.mrb[55].mxu0  ;;  %v1655_v41 = vpop.f32.mrb[55].mxu1 }
 0x148   :  { %v2579_v23 = vpack.c.bf16 %v2032_v32, %v2032_v32  ;;  %v1928_v45 = vmax.f32 %v1830_v24, %v1879_v31  ;;  %v1930_v53 = vmax.f32 %v1832_v40, %v1881_v42  ;;  %v1831_v54 = vmax.f32 %v3461_v49, %v1255_v28 }
 0x149   :  { %v1882_v38 = vmax.f32 %v3463_v50, %v1655_v41 }
 0x14a   :  { %2279 = vst.msk [vmem:[%s4000_s3 + $0x8] sm:$0xf] %vm2276_vm3, %v2579_v23  ;;  %v1984_v43 = vadd.f32 %v3652_v46, %v1928_v45  ;;  %v1986_v44 = vadd.f32 %v3652_v46, %v1930_v53  ;;  %v1929_v47 = vmax.f32 %v1831_v54, %v1880_v36 }
 0x14b   :  { %v1931_v48 = vmax.f32 %v1833_v26, %v1882_v38 }
 0x14c   :  { %v2033_v25 = vmax.f32 %v1984_v43, 0.0  ;;  %v2035_v27 = vmax.f32 %v1986_v44, 0.0  ;;  %v1985_v24 = vadd.f32 %v3652_v46, %v1929_v47  ;;  %v2785_v31 = vpop.f32.mrb[56].mxu0  ;;  %v2885_v32 = vpop.f32.mrb[56].mxu1 }
 0x14d   :  { %v1987_v49 = vadd.f32 %v3652_v46, %v1931_v48  ;;  %v1836_v41 = vmax.f32 %v3485_v61, %v2785_v31  ;;  %v1887_v50 = vmax.f32 %v3487_v62, %v2885_v32  ;;  %v1268_v39 = vpop.f32.mrb[57].mxu0  ;;  %v1668_v23 = vpop.f32.mrb[57].mxu1 }
 0x14e   :  { %v2580_v40 = vpack.c.bf16 %v2033_v25, %v2033_v25  ;;  %v2582_v34 = vpack.c.bf16 %v2035_v27, %v2035_v27  ;;  %v2034_v42 = vmax.f32 %v1985_v24, 0.0  ;;  %v1834_v36 = vmax.f32 %v3465_v51, %v1268_v39  ;;  %v2786_v37 = vpop.f32.mrb[58].mxu0  ;;  %v2886_v26 = vpop.f32.mrb[58].mxu1 }
 0x14f   :  { %v2036_v28 = vmax.f32 %v1987_v49, 0.0  ;;  %v1885_v45 = vmax.f32 %v3467_v52, %v1668_v23  ;;  %v1837_v53 = vmax.f32 %v3473_v55, %v2786_v37  ;;  %v1888_v54 = vmax.f32 %v3475_v56, %v2886_v26  ;;  %v1271_v38 = vpop.f32.mrb[59].mxu0  ;;  %v1671_v61 = vpop.f32.mrb[59].mxu1 }
 0x150   :  { %2280 = vst.msk [vmem:[%s4000_s3 + $0xc] sm:$0xf] %vm2276_vm3, %v2580_v40  ;;  %2282 = vst.msk [vmem:[%s4000_s3 + $0x14] sm:$0xf] %vm2276_vm3, %v2582_v34  ;;  %v2581_v51 = vpack.c.bf16 %v2034_v42, %v2034_v42  ;;  %v1932_v62 = vmax.f32 %v1834_v36, %v1883_v33  ;;  %v1835_v52 = vmax.f32 %v3477_v57, %v1271_v38 }
 0x151   :  { %v1886_v55 = vmax.f32 %v3479_v58, %v1671_v61  ;;  %v2583_v43 = vpack.c.bf16 %v2036_v28, %v2036_v28  ;;  %v1934_v56 = vmax.f32 %v1836_v41, %v1885_v45 }
 0x152   :  { %2281 = vst.msk [vmem:[%s4000_s3 + $0x10] sm:$0xf] %vm2276_vm3, %v2581_v51  ;;  %v1988_v44 = vadd.f32 %v3652_v46, %v1932_v62  ;;  %v1933_v47 = vmax.f32 %v1835_v52, %v1884_v35 }
 0x153   :  { %v1935_v48 = vmax.f32 %v1837_v53, %v1886_v55  ;;  %2283 = vst.msk [vmem:[%s4000_s3 + $0x18] sm:$0xf] %vm2276_vm3, %v2583_v43  ;;  %v1990_v57 = vadd.f32 %v3652_v46, %v1934_v56 }
 0x154   :  { %v2037_v33 = vmax.f32 %v1988_v44, 0.0  ;;  %v1989_v58 = vadd.f32 %v3652_v46, %v1933_v47  ;;  %v2789_v27 = vpop.f32.mrb[60].mxu0  ;;  %v2889_v24 = vpop.f32.mrb[60].mxu1 }
 0x155   :  { %v1991_v25 = vadd.f32 %v3652_v46, %v1935_v48  ;;  %v2039_v31 = vmax.f32 %v1990_v57, 0.0  ;;  %v1840_v32 = vmax.f32 %v3501_v5, %v2789_v27  ;;  %v1891_v35 = vmax.f32 %v3503_v6, %v2889_v24  ;;  %v1284_v49 = vpop.f32.mrb[61].mxu0  ;;  %v1684_v41 = vpop.f32.mrb[61].mxu1 }
 0x156   :  { %v2584_v39 = vpack.c.bf16 %v2037_v33, %v2037_v33  ;;  %v2038_v23 = vmax.f32 %v1989_v58, 0.0  ;;  %v1838_v34 = vmax.f32 %v3481_v59, %v1284_v49  ;;  %v2790_v42 = vpop.f32.mrb[62].mxu0  ;;  %v2890_v36 = vpop.f32.mrb[62].mxu1  ;;  %v1889_v26 = vmax.f32 %v3483_v60, %v1684_v41 }
 0x157   :  { %v2040_v40 = vmax.f32 %v1991_v25, 0.0  ;;  %v2586_v37 = vpack.c.bf16 %v2039_v31, %v2039_v31  ;;  %v1841_v28 = vmax.f32 %v3489_v63, %v2790_v42  ;;  %v1892_v45 = vmax.f32 %v3491_v0, %v2890_v36  ;;  %v1287_v53 = vpop.f32.mrb[63].mxu0  ;;  %v1687_v5 = vpop.f32.mrb[63].mxu1 }
 0x158   :  { %2284 = vst.msk [vmem:[%s4000_s3 + $0x1c] sm:$0xf] %vm2276_vm3, %v2584_v39  ;;  %v2585_v6 = vpack.c.bf16 %v2038_v23, %v2038_v23  ;;  %v1936_v61 = vmax.f32 %v1838_v34, %v1887_v50  ;;  %v1839_v59 = vmax.f32 %v3493_v1, %v1287_v53  ;;  %v1938_v60 = vmax.f32 %v1840_v32, %v1889_v26 }
 0x159   :  { %v2587_v38 = vpack.c.bf16 %v2040_v40, %v2040_v40  ;;  %2286 = vst.msk [vmem:[%s4000_s3 + $0x24] sm:$0xf] %vm2276_vm3, %v2586_v37  ;;  %v1890_v63 = vmax.f32 %v3495_v2, %v1687_v5 }
 0x15a   :  { %2285 = vst.msk [vmem:[%s4000_s3 + $0x20] sm:$0xf] %vm2276_vm3, %v2585_v6  ;;  %v1992_v0 = vadd.f32 %v3652_v46, %v1936_v61  ;;  %v1937_v1 = vmax.f32 %v1839_v59, %v1888_v54  ;;  %v1994_v50 = vadd.f32 %v3652_v46, %v1938_v60 }
 0x15b   :  { %2287 = vst.msk [vmem:[%s4000_s3 + $0x28] sm:$0xf] %vm2276_vm3, %v2587_v38  ;;  %v1939_v51 = vmax.f32 %v1841_v28, %v1890_v63 }
 0x15c   :  { %v2041_v62 = vmax.f32 %v1992_v0, 0.0  ;;  %v1993_v52 = vadd.f32 %v3652_v46, %v1937_v1  ;;  %v2793_v2 = vpop.f32.mrb[64].mxu0  ;;  %v2893_v55 = vpop.f32.mrb[64].mxu1  ;;  %v2043_v43 = vmax.f32 %v1994_v50, 0.0 }
 0x15d   :  { %v1995_v56 = vadd.f32 %v3652_v46, %v1939_v51  ;;  %v1844_v44 = vmax.f32 %v3517_v13, %v2793_v2  ;;  %v1895_v47 = vmax.f32 %v3519_v14, %v2893_v55  ;;  %v1300_v48 = vpop.f32.mrb[65].mxu0  ;;  %v1700_v57 = vpop.f32.mrb[65].mxu1 }
 0x15e   :  { %v2588_v33 = vpack.c.bf16 %v2041_v62, %v2041_v62  ;;  %v2042_v58 = vmax.f32 %v1993_v52, 0.0  ;;  %v1842_v54 = vmax.f32 %v3497_v3, %v1300_v48  ;;  %v1893_v25 = vmax.f32 %v3499_v4, %v1700_v57  ;;  %v2794_v27 = vpop.f32.mrb[66].mxu0  ;;  %v2894_v24 = vpop.f32.mrb[66].mxu1 }
 0x15f   :  { %v2590_v31 = vpack.c.bf16 %v2043_v43, %v2043_v43  ;;  %v2044_v32 = vmax.f32 %v1995_v56, 0.0  ;;  %v1845_v49 = vmax.f32 %v3505_v7, %v2794_v27  ;;  %v1896_v41 = vmax.f32 %v3507_v8, %v2894_v24  ;;  %v1303_v39 = vpop.f32.mrb[67].mxu0  ;;  %v1703_v13 = vpop.f32.mrb[67].mxu1 }
 0x160   :  { %2288 = vst.msk [vmem:[%s4000_s3 + $0x2c] sm:$0xf] %vm2276_vm3, %v2588_v33  ;;  %v2589_v14 = vpack.c.bf16 %v2042_v58, %v2042_v58  ;;  %v1940_v23 = vmax.f32 %v1842_v54, %v1891_v35  ;;  %v1942_v3 = vmax.f32 %v1844_v44, %v1893_v25  ;;  %v1843_v4 = vmax.f32 %v3509_v9, %v1303_v39 }
 0x161   :  { %2290 = vst.msk [vmem:[%s4000_s3 + $0x34] sm:$0xf] %vm2276_vm3, %v2590_v31  ;;  %v2591_v7 = vpack.c.bf16 %v2044_v32, %v2044_v32  ;;  %v1894_v8 = vmax.f32 %v3511_v10, %v1703_v13 }
 0x162   :  { %2289 = vst.msk [vmem:[%s4000_s3 + $0x30] sm:$0xf] %vm2276_vm3, %v2589_v14  ;;  %v1996_v40 = vadd.f32 %v3652_v46, %v1940_v23  ;;  %v1998_v35 = vadd.f32 %v3652_v46, %v1942_v3  ;;  %v1941_v34 = vmax.f32 %v1843_v4, %v1892_v45  ;;  %v4057_v23 = vld [vmem:[#allocation4_spill] sm:$0xff]  ;;  %v4058_v4 = vld [vmem:[#allocation5_spill] sm:$0xff] }
 0x163   :  { %2291 = vst.msk [vmem:[%s4000_s3 + $0x38] sm:$0xf] %vm2276_vm3, %v2591_v7  ;;  %v1943_v9 = vmax.f32 %v1845_v49, %v1894_v8 }
 0x164   :  { %v2045_v42 = vmax.f32 %v1996_v40, 0.0  ;;  %v2047_v36 = vmax.f32 %v1998_v35, 0.0  ;;  %v1997_v10 = vadd.f32 %v3652_v46, %v1941_v34  ;;  %v2797_v37 = vpop.f32.mrb[68].mxu0  ;;  %v2897_v26 = vpop.f32.mrb[68].mxu1 }
 0x165   :  { %v1999_v28 = vadd.f32 %v3652_v46, %v1943_v9  ;;  %v1848_v53 = vmax.f32 %v3533_v21, %v2797_v37  ;;  %v1899_v5 = vmax.f32 %v3535_v22, %v2897_v26  ;;  %v1316_v6 = vpop.f32.mrb[69].mxu0  ;;  %v1716_v45 = vpop.f32.mrb[69].mxu1  ;;  %v4060_v9 = vld [vmem:[#allocation7_spill] sm:$0xff] }
 0x166   :  { %v2592_v38 = vpack.c.bf16 %v2045_v42, %v2045_v42  ;;  %v2594_v61 = vpack.c.bf16 %v2047_v36, %v2047_v36  ;;  %v2046_v59 = vmax.f32 %v1997_v10, 0.0  ;;  %v1846_v60 = vmax.f32 %v3513_v11, %v1316_v6  ;;  %v2798_v63 = vpop.f32.mrb[70].mxu0  ;;  %v2898_v0 = vpop.f32.mrb[70].mxu1 }
 0x167   :  { %v2048_v1 = vmax.f32 %v1999_v28, 0.0  ;;  %v1897_v50 = vmax.f32 %v3515_v12, %v1716_v45  ;;  %v1849_v51 = vmax.f32 %v3521_v15, %v2798_v63  ;;  %v1900_v62 = vmax.f32 %v3523_v16, %v2898_v0  ;;  %v1319_v52 = vpop.f32.mrb[71].mxu0  ;;  %v1719_v21 = vpop.f32.mrb[71].mxu1 }
 0x168   :  { %2292 = vst.msk [vmem:[%s4000_s3 + $0x3c] sm:$0xf] %vm2276_vm3, %v2592_v38  ;;  %2294 = vst.msk [vmem:[%s4000_s3 + $0x44] sm:$0xf] %vm2276_vm3, %v2594_v61  ;;  %v2593_v11 = vpack.c.bf16 %v2046_v59, %v2046_v59  ;;  %v1944_v22 = vmax.f32 %v1846_v60, %v1895_v47  ;;  %v1847_v12 = vmax.f32 %v3525_v17, %v1319_v52  ;;  %v4061_v61 = vld [vmem:[#allocation16_spill] sm:$0xff]  ;;  %v4062_v60 = vld [vmem:[#allocation17_spill] sm:$0xff] }
 0x169   :  { %v1898_v15 = vmax.f32 %v3527_v18, %v1719_v21  ;;  %v2595_v2 = vpack.c.bf16 %v2048_v1, %v2048_v1  ;;  %v1946_v16 = vmax.f32 %v1848_v53, %v1897_v50  ;;  %v4064_v21 = vld [vmem:[#allocation9_spill] sm:$0xff] }
 0x16a   :  { %2293 = vst.msk [vmem:[%s4000_s3 + $0x40] sm:$0xf] %vm2276_vm3, %v2593_v11  ;;  %v2000_v55 = vadd.f32 %v3652_v46, %v1944_v22  ;;  %v1945_v43 = vmax.f32 %v1847_v12, %v1896_v41 }
 0x16b   :  { %v1947_v56 = vmax.f32 %v1849_v51, %v1898_v15  ;;  %2295 = vst.msk [vmem:[%s4000_s3 + $0x48] sm:$0xf] %vm2276_vm3, %v2595_v2  ;;  %v2002_v17 = vadd.f32 %v3652_v46, %v1946_v16  ;;  %v4065_v16 = vld [vmem:[#allocation10_spill] sm:$0xff] }
 0x16c   :  { %v2049_v44 = vmax.f32 %v2000_v55, 0.0  ;;  %v2001_v18 = vadd.f32 %v3652_v46, %v1945_v43  ;;  %v2801_v48 = vpop.f32.mrb[72].mxu0  ;;  %v2901_v57 = vpop.f32.mrb[72].mxu1  ;;  %v4066_v43 = vld [vmem:[#allocation11_spill] sm:$0xff] }
 0x16d   :  { %v2003_v47 = vadd.f32 %v3652_v46, %v1947_v56  ;;  %v2051_v33 = vmax.f32 %v2002_v17, 0.0  ;;  %v1852_v58 = vmax.f32 %v3549_v29, %v2801_v48  ;;  %v1903_v54 = vmax.f32 %v3551_v30, %v2901_v57  ;;  %v1332_v25 = vpop.f32.mrb[73].mxu0  ;;  %v1732_v27 = vpop.f32.mrb[73].mxu1  ;;  %v4067_v57 = vld [vmem:[#allocation12_spill] sm:$0xff] }
 0x16e   :  { %v2596_v24 = vpack.c.bf16 %v2049_v44, %v2049_v44  ;;  %v2050_v31 = vmax.f32 %v2001_v18, 0.0  ;;  %v1850_v49 = vmax.f32 %v3529_v19, %v1332_v25  ;;  %v2802_v41 = vpop.f32.mrb[74].mxu0  ;;  %v2902_v39 = vpop.f32.mrb[74].mxu1  ;;  %v1901_v14 = vmax.f32 %v3531_v20, %v1732_v27  ;;  %v4059_v19 = vld [vmem:[#allocation6_spill] sm:$0xff]  ;;  %v4068_v25 = vld [vmem:[#allocation13_spill] sm:$0xff] }
 0x16f   :  { %v2052_v32 = vmax.f32 %v2003_v47, 0.0  ;;  %v2598_v13 = vpack.c.bf16 %v2051_v33, %v2051_v33  ;;  %v1853_v3 = vmax.f32 %v4057_v23, %v2802_v41  ;;  %v1904_v7 = vmax.f32 %v4058_v4, %v2902_v39  ;;  %v1335_v8 = vpop.f32.mrb[75].mxu0  ;;  %v1735_v29 = vpop.f32.mrb[75].mxu1 }
 0x170   :  { %2296 = vst.msk [vmem:[%s4000_s3 + $0x4c] sm:$0xf] %vm2276_vm3, %v2596_v24  ;;  %v2597_v30 = vpack.c.bf16 %v2050_v31, %v2050_v31  ;;  %v1948_v35 = vmax.f32 %v1850_v49, %v1899_v5  ;;  %v1851_v34 = vmax.f32 %v4059_v19, %v1335_v8  ;;  %v1950_v20 = vmax.f32 %v1852_v58, %v1901_v14  ;;  %v4070_v8 = vld [vmem:[#allocation25_spill] sm:$0xff] }
 0x171   :  { %v2599_v40 = vpack.c.bf16 %v2052_v32, %v2052_v32  ;;  %2298 = vst.msk [vmem:[%s4000_s3 + $0x54] sm:$0xf] %vm2276_vm3, %v2598_v13  ;;  %v1902_v42 = vmax.f32 %v4060_v9, %v1735_v29 }
 0x172   :  { %2297 = vst.msk [vmem:[%s4000_s3 + $0x50] sm:$0xf] %vm2276_vm3, %v2597_v30  ;;  %v2004_v36 = vadd.f32 %v3652_v46, %v1948_v35  ;;  %v1949_v10 = vmax.f32 %v1851_v34, %v1900_v62  ;;  %v2006_v37 = vadd.f32 %v3652_v46, %v1950_v20  ;;  %v4063_v62 = vld [vmem:[#allocation8_spill] sm:$0xff]  ;;  %v4071_v34 = vld [vmem:[#allocation14_spill] sm:$0xff] }
 0x173   :  { %2299 = vst.msk [vmem:[%s4000_s3 + $0x58] sm:$0xf] %vm2276_vm3, %v2599_v40  ;;  %v1951_v26 = vmax.f32 %v1853_v3, %v1902_v42  ;;  %v4069_v3 = vld [vmem:[#allocation24_spill] sm:$0xff] }
 0x174   :  { %v2053_v28 = vmax.f32 %v2004_v36, 0.0  ;;  %v2005_v53 = vadd.f32 %v3652_v46, %v1949_v10  ;;  %v2805_v5 = vpop.f32.mrb[76].mxu0  ;;  %v2905_v6 = vpop.f32.mrb[76].mxu1  ;;  %v2055_v45 = vmax.f32 %v2006_v37, 0.0  ;;  %v4072_v10 = vld [vmem:[#allocation15_spill] sm:$0xff] }
 0x175   :  { %v2007_v38 = vadd.f32 %v3652_v46, %v1951_v26  ;;  %v1856_v59 = vmax.f32 %v4061_v61, %v2805_v5  ;;  %v1907_v63 = vmax.f32 %v4062_v60, %v2905_v6  ;;  %v1348_v0 = vpop.f32.mrb[77].mxu0  ;;  %v1748_v1 = vpop.f32.mrb[77].mxu1  ;;  %v4073_v26 = vld [vmem:[#allocation18_spill] sm:$0xff] }
 0x176   :  { %v2600_v50 = vpack.c.bf16 %v2053_v28, %v2053_v28  ;;  %v2054_v51 = vmax.f32 %v2005_v53, 0.0  ;;  %v1854_v52 = vmax.f32 %v4063_v62, %v1348_v0  ;;  %v1905_v11 = vmax.f32 %v4064_v21, %v1748_v1  ;;  %v2806_v22 = vpop.f32.mrb[78].mxu0  ;;  %v2906_v12 = vpop.f32.mrb[78].mxu1  ;;  %v4074_v53 = vld [vmem:[#allocation19_spill] sm:$0xff]  ;;  %v4076_v0 = vld [vmem:[#allocation21_spill] sm:$0xff] }
 0x177   :  { %v2602_v15 = vpack.c.bf16 %v2055_v45, %v2055_v45  ;;  %v2056_v2 = vmax.f32 %v2007_v38, 0.0  ;;  %v1857_v55 = vmax.f32 %v4065_v16, %v2806_v22  ;;  %v1908_v56 = vmax.f32 %v4066_v43, %v2906_v12  ;;  %v1351_v17 = vpop.f32.mrb[79].mxu0  ;;  %v1751_v44 = vpop.f32.mrb[79].mxu1 }
 0x178   :  { %2300 = vst.msk [vmem:[%s4000_s3 + $0x5c] sm:$0xf] %vm2276_vm3, %v2600_v50  ;;  %v2601_v18 = vpack.c.bf16 %v2054_v51, %v2054_v51  ;;  %v1952_v47 = vmax.f32 %v1854_v52, %v1903_v54  ;;  %v1954_v48 = vmax.f32 %v1856_v59, %v1905_v11  ;;  %v1855_v33 = vmax.f32 %v4067_v57, %v1351_v17  ;;  %v4075_v59 = vld [vmem:[#allocation20_spill] sm:$0xff]  ;;  %v4078_v17 = vld [vmem:[#allocation33_spill] sm:$0xff] }
 0x179   :  { %2302 = vst.msk [vmem:[%s4000_s3 + $0x64] sm:$0xf] %vm2276_vm3, %v2602_v15  ;;  %v2603_v58 = vpack.c.bf16 %v2056_v2, %v2056_v2  ;;  %v1906_v27 = vmax.f32 %v4068_v25, %v1751_v44 }
 0x17a   :  { %2301 = vst.msk [vmem:[%s4000_s3 + $0x60] sm:$0xf] %vm2276_vm3, %v2601_v18  ;;  %v2008_v24 = vadd.f32 %v3652_v46, %v1952_v47  ;;  %v2010_v54 = vadd.f32 %v3652_v46, %v1954_v48  ;;  %v1953_v31 = vmax.f32 %v1855_v33, %v1904_v7  ;;  %v4079_v33 = vld [vmem:[#allocation22_spill] sm:$0xff] }
 0x17b   :  { %2303 = vst.msk [vmem:[%s4000_s3 + $0x68] sm:$0xf] %vm2276_vm3, %v2603_v58  ;;  %v1955_v32 = vmax.f32 %v1857_v55, %v1906_v27  ;;  %v4077_v55 = vld [vmem:[#allocation32_spill] sm:$0xff] }
 0x17c   :  { %v2057_v49 = vmax.f32 %v2008_v24, 0.0  ;;  %v2059_v41 = vmax.f32 %v2010_v54, 0.0  ;;  %v2009_v39 = vadd.f32 %v3652_v46, %v1953_v31  ;;  %v2809_v13 = vpop.f32.mrb[80].mxu0  ;;  %v2909_v14 = vpop.f32.mrb[80].mxu1  ;;  %v4080_v54 = vld [vmem:[#allocation23_spill] sm:$0xff] }
 0x17d   :  { %v2011_v23 = vadd.f32 %v3652_v46, %v1955_v32  ;;  %v1860_v4 = vmax.f32 %v4069_v3, %v2809_v13  ;;  %v1911_v29 = vmax.f32 %v4070_v8, %v2909_v14  ;;  %v1364_v30 = vpop.f32.mrb[81].mxu0  ;;  %v1764_v7 = vpop.f32.mrb[81].mxu1  ;;  %v4081_v32 = vld [vmem:[#allocation26_spill] sm:$0xff]  ;;  %v4083_v8 = vld [vmem:[#allocation28_spill] sm:$0xff] }
 0x17e   :  { %v2604_v40 = vpack.c.bf16 %v2057_v49, %v2057_v49  ;;  %v2606_v35 = vpack.c.bf16 %v2059_v41, %v2059_v41  ;;  %v2058_v19 = vmax.f32 %v2009_v39, 0.0  ;;  %v1858_v20 = vmax.f32 %v4071_v34, %v1364_v30  ;;  %v2810_v9 = vpop.f32.mrb[82].mxu0  ;;  %v2910_v42 = vpop.f32.mrb[82].mxu1  ;;  %v4082_v41 = vld [vmem:[#allocation27_spill] sm:$0xff] }
 0x17f   :  { %v2060_v36 = vmax.f32 %v2011_v23, 0.0  ;;  %v1909_v37 = vmax.f32 %v4072_v10, %v1764_v7  ;;  %v1861_v28 = vmax.f32 %v4073_v26, %v2810_v9  ;;  %v1912_v5 = vmax.f32 %v4074_v53, %v2910_v42  ;;  %v1367_v6 = vpop.f32.mrb[83].mxu0  ;;  %v1767_v45 = vpop.f32.mrb[83].mxu1 }
 0x180   :  { %2304 = vst.msk [vmem:[%s4000_s3 + $0x6c] sm:$0xf] %vm2276_vm3, %v2604_v40  ;;  %2306 = vst.msk [vmem:[%s4000_s3 + $0x74] sm:$0xf] %vm2276_vm3, %v2606_v35  ;;  %v2605_v38 = vpack.c.bf16 %v2058_v19, %v2058_v19  ;;  %v1956_v61 = vmax.f32 %v1858_v20, %v1907_v63  ;;  %v1859_v60 = vmax.f32 %v4075_v59, %v1367_v6  ;;  %v4084_v40 = vld [vmem:[#allocation29_spill] sm:$0xff] }
 0x181   :  { %v1910_v1 = vmax.f32 %v4076_v0, %v1767_v45  ;;  %v2607_v50 = vpack.c.bf16 %v2060_v36, %v2060_v36  ;;  %v1958_v51 = vmax.f32 %v1860_v4, %v1909_v37  ;;  %v4086_v6 = vld [vmem:[#allocation41_spill] sm:$0xff] }
 0x182   :  { %2305 = vst.msk [vmem:[%s4000_s3 + $0x70] sm:$0xf] %vm2276_vm3, %v2605_v38  ;;  %v2012_v62 = vadd.f32 %v3652_v46, %v1956_v61  ;;  %v1957_v52 = vmax.f32 %v1859_v60, %v1908_v56 }
 0x183   :  { %v1959_v21 = vmax.f32 %v1861_v28, %v1910_v1  ;;  %2307 = vst.msk [vmem:[%s4000_s3 + $0x78] sm:$0xf] %vm2276_vm3, %v2607_v50  ;;  %v2014_v63 = vadd.f32 %v3652_v46, %v1958_v51  ;;  %v4085_v28 = vld [vmem:[#allocation40_spill] sm:$0xff]  ;;  %v4088_v1 = vld [vmem:[#allocation31_spill] sm:$0xff] }
 0x184   :  { %v2061_v11 = vmax.f32 %v2012_v62, 0.0  ;;  %v2013_v22 = vadd.f32 %v3652_v46, %v1957_v52  ;;  %v2813_v15 = vpop.f32.mrb[84].mxu0  ;;  %v2913_v2 = vpop.f32.mrb[84].mxu1 }
 0x185   :  { %v2015_v12 = vadd.f32 %v3652_v46, %v1959_v21  ;;  %v2063_v16 = vmax.f32 %v2014_v63, 0.0  ;;  %v1864_v43 = vmax.f32 %v4077_v55, %v2813_v15  ;;  %v1915_v56 = vmax.f32 %v4078_v17, %v2913_v2  ;;  %v1380_v44 = vpop.f32.mrb[85].mxu0  ;;  %v1780_v18 = vpop.f32.mrb[85].mxu1  ;;  %v4089_v63 = vld [vmem:[#allocation34_spill] sm:$0xff]  ;;  %v4091_v17 = vld [vmem:[#allocation36_spill] sm:$0xff] }
 0x186   :  { %v2608_v47 = vpack.c.bf16 %v2061_v11, %v2061_v11  ;;  %v2062_v48 = vmax.f32 %v2013_v22, 0.0  ;;  %v1862_v58 = vmax.f32 %v4079_v33, %v1380_v44  ;;  %v2814_v25 = vpop.f32.mrb[86].mxu0  ;;  %v2914_v27 = vpop.f32.mrb[86].mxu1  ;;  %v1913_v31 = vmax.f32 %v4080_v54, %v1780_v18  ;;  %v4090_v22 = vld [vmem:[#allocation35_spill] sm:$0xff] }
 0x187   :  { %v2064_v57 = vmax.f32 %v2015_v12, 0.0  ;;  %v2610_v24 = vpack.c.bf16 %v2063_v16, %v2063_v16  ;;  %v1865_v49 = vmax.f32 %v4081_v32, %v2814_v25  ;;  %v1916_v39 = vmax.f32 %v4082_v41, %v2914_v27  ;;  %v1383_v13 = vpop.f32.mrb[87].mxu0  ;;  %v1783_v14 = vpop.f32.mrb[87].mxu1 }
 0x188   :  { %2308 = vst.msk [vmem:[%s4000_s3 + $0x7c] sm:$0xf] %vm2276_vm3, %v2608_v47  ;;  %v2609_v23 = vpack.c.bf16 %v2062_v48, %v2062_v48  ;;  %v1960_v4 = vmax.f32 %v1862_v58, %v1911_v29  ;;  %v1863_v30 = vmax.f32 %v4083_v8, %v1383_v13  ;;  %v1962_v7 = vmax.f32 %v1864_v43, %v1913_v31  ;;  %v4092_v47 = vld [vmem:[#allocation37_spill] sm:$0xff] }
 0x189   :  { %v2611_v3 = vpack.c.bf16 %v2064_v57, %v2064_v57  ;;  %2310 = vst.msk [vmem:[%s4000_s3 + $0x84] sm:$0xf] %vm2276_vm3, %v2610_v24  ;;  %v1914_v35 = vmax.f32 %v4084_v40, %v1783_v14  ;;  %v4094_v13 = vld [vmem:[#allocation49_spill] sm:$0xff] }
 0x18a   :  { %2309 = vst.msk [vmem:[%s4000_s3 + $0x80] sm:$0xf] %vm2276_vm3, %v2609_v23  ;;  %v2016_v29 = vadd.f32 %v3652_v46, %v1960_v4  ;;  %v1961_v19 = vmax.f32 %v1863_v30, %v1912_v5  ;;  %v2018_v34 = vadd.f32 %v3652_v46, %v1962_v7  ;;  %v4087_v5 = vld [vmem:[#allocation30_spill] sm:$0xff] }
 0x18b   :  { %2311 = vst.msk [vmem:[%s4000_s3 + $0x88] sm:$0xf] %vm2276_vm3, %v2611_v3  ;;  %v1963_v20 = vmax.f32 %v1865_v49, %v1914_v35  ;;  %v4093_v49 = vld [vmem:[#allocation48_spill] sm:$0xff]  ;;  %v4095_v30 = vld [vmem:[#allocation38_spill] sm:$0xff] }
 0x18c   :  { %v2065_v9 = vmax.f32 %v2016_v29, 0.0  ;;  %v2017_v42 = vadd.f32 %v3652_v46, %v1961_v19  ;;  %v2817_v36 = vpop.f32.mrb[88].mxu0  ;;  %v2917_v10 = vpop.f32.mrb[88].mxu1  ;;  %v2067_v37 = vmax.f32 %v2018_v34, 0.0  ;;  %v4096_v19 = vld [vmem:[#allocation39_spill] sm:$0xff] }
 0x18d   :  { %v2019_v26 = vadd.f32 %v3652_v46, %v1963_v20  ;;  %v1868_v53 = vmax.f32 %v4085_v28, %v2817_v36  ;;  %v1919_v45 = vmax.f32 %v4086_v6, %v2917_v10  ;;  %v1396_v38 = vpop.f32.mrb[89].mxu0  ;;  %v1796_v61 = vpop.f32.mrb[89].mxu1  ;;  %v4097_v20 = vld [vmem:[#allocation42_spill] sm:$0xff] }
 0x18e   :  { %v2612_v59 = vpack.c.bf16 %v2065_v9, %v2065_v9  ;;  %v2066_v60 = vmax.f32 %v2017_v42, 0.0  ;;  %v1866_v0 = vmax.f32 %v4087_v5, %v1396_v38  ;;  %v1917_v50 = vmax.f32 %v4088_v1, %v1796_v61  ;;  %v2818_v51 = vpop.f32.mrb[90].mxu0  ;;  %v2918_v62 = vpop.f32.mrb[90].mxu1  ;;  %v4098_v42 = vld [vmem:[#allocation43_spill] sm:$0xff]  ;;  %v4100_v38 = vld [vmem:[#allocation45_spill] sm:$0xff] }
 0x18f   :  { %v2614_v52 = vpack.c.bf16 %v2067_v37, %v2067_v37  ;;  %v2068_v21 = vmax.f32 %v2019_v26, 0.0  ;;  %v1869_v11 = vmax.f32 %v4089_v63, %v2818_v51  ;;  %v1920_v12 = vmax.f32 %v4090_v22, %v2918_v62  ;;  %v1399_v15 = vpop.f32.mrb[91].mxu0  ;;  %v1799_v2 = vpop.f32.mrb[91].mxu1  ;;  %v4101_v63 = vld [vmem:[#allocation47_spill] sm:$0xff] }
 0x190   :  { %2312 = vst.msk [vmem:[%s4000_s3 + $0x8c] sm:$0xf] %vm2276_vm3, %v2612_v59  ;;  %v2613_v16 = vpack.c.bf16 %v2066_v60, %v2066_v60  ;;  %v1964_v55 = vmax.f32 %v1866_v0, %v1915_v56  ;;  %v1966_v43 = vmax.f32 %v1868_v53, %v1917_v50  ;;  %v1867_v44 = vmax.f32 %v4091_v17, %v1399_v15  ;;  %v4099_v53 = vld [vmem:[#allocation44_spill] sm:$0xff] }
 0x191   :  { %2314 = vst.msk [vmem:[%s4000_s3 + $0x94] sm:$0xf] %vm2276_vm3, %v2614_v52  ;;  %v2615_v18 = vpack.c.bf16 %v2068_v21, %v2068_v21  ;;  %v1918_v48 = vmax.f32 %v4092_v47, %v1799_v2 }
 0x192   :  { %2313 = vst.msk [vmem:[%s4000_s3 + $0x90] sm:$0xf] %vm2276_vm3, %v2613_v16  ;;  %v2020_v57 = vadd.f32 %v3652_v46, %v1964_v55  ;;  %v2022_v56 = vadd.f32 %v3652_v46, %v1966_v43  ;;  %v1965_v33 = vmax.f32 %v1867_v44, %v1916_v39  ;;  %v4102_v16 = vld [vmem:[#allocation46_spill] sm:$0xff] }
 0x193   :  { %2315 = vst.msk [vmem:[%s4000_s3 + $0x98] sm:$0xf] %vm2276_vm3, %v2615_v18  ;;  %v1967_v58 = vmax.f32 %v1869_v11, %v1918_v48  ;;  %v4103_v44 = vld [vmem:[#allocation2_spill] sm:$0xff]  ;;  %v4104_v18 = vld [vmem:[#allocation53_spill] sm:$0xff] }
 0x194   :  { %v2069_v25 = vmax.f32 %v2020_v57, 0.0  ;;  %v2071_v27 = vmax.f32 %v2022_v56, 0.0  ;;  %v2021_v24 = vadd.f32 %v3652_v46, %v1965_v33  ;;  %v2821_v54 = vpop.f32.mrb[92].mxu0  ;;  %v2921_v31 = vpop.f32.mrb[92].mxu1  ;;  %v4105_v47 = vmax.f32 %v4103_v44, %v4104_v18  ;;  %v4106_v57 = vld [vmem:[#allocation52_spill] sm:$0xff] }
 0x195   :  { %v2023_v32 = vadd.f32 %v3652_v46, %v1967_v58  ;;  %v1872_v41 = vmax.f32 %v4093_v49, %v2821_v54  ;;  %v1923_v14 = vmax.f32 %v4094_v13, %v2921_v31  ;;  %v1412_v23 = vpop.f32.mrb[93].mxu0  ;;  %v1812_v39 = vpop.f32.mrb[93].mxu1  ;;  %v4109_v49 = vld [vmem:[#allocation50_spill] sm:$0xff] }
 0x196   :  { %v2616_v3 = vpack.c.bf16 %v2069_v25, %v2069_v25  ;;  %v2618_v4 = vpack.c.bf16 %v2071_v27, %v2071_v27  ;;  %v2070_v8 = vmax.f32 %v2021_v24, 0.0  ;;  %v1870_v7 = vmax.f32 %v4095_v30, %v1412_v23  ;;  %v2822_v40 = vpop.f32.mrb[94].mxu0  ;;  %v2922_v35 = vpop.f32.mrb[94].mxu1  ;;  %v4107_v24 = vld [vmem:[#allocation51_spill] sm:$0xff] }
 0x197   :  { %v2072_v29 = vmax.f32 %v2023_v32, 0.0  ;;  %v1921_v34 = vmax.f32 %v4096_v19, %v1812_v39  ;;  %v1873_v9 = vmax.f32 %v4097_v20, %v2822_v40  ;;  %v1924_v36 = vmax.f32 %v4098_v42, %v2922_v35  ;;  %v1415_v10 = vpop.f32.mrb[95].mxu0  ;;  %v1815_v37 = vpop.f32.mrb[95].mxu1  ;;  %v4108_v32 = vld [vmem:[#allocation3_spill] sm:$0xff] }
 0x198   :  { %2316 = vst.msk [vmem:[%s4000_s3 + $0x9c] sm:$0xf] %vm2276_vm3, %v2616_v3  ;;  %2318 = vst.msk [vmem:[%s4000_s3 + $0xa4] sm:$0xf] %vm2276_vm3, %v2618_v4  ;;  %v2617_v26 = vpack.c.bf16 %v2070_v8, %v2070_v8  ;;  %v1968_v28 = vmax.f32 %v1870_v7, %v1919_v45  ;;  %v1871_v6 = vmax.f32 %v4099_v53, %v1415_v10 }
 0x199   :  { %v1922_v61 = vmax.f32 %v4100_v38, %v1815_v37  ;;  %v2619_v59 = vpack.c.bf16 %v2072_v29, %v2072_v29  ;;  %v1970_v60 = vmax.f32 %v1872_v41, %v1921_v34  ;;  %v4110_v41 = vmax.f32 %v4108_v32, %v4109_v49 }
 0x19a   :  { %2317 = vst.msk [vmem:[%s4000_s3 + $0xa0] sm:$0xf] %vm2276_vm3, %v2617_v26  ;;  %v2024_v5 = vadd.f32 %v3652_v46, %v1968_v28  ;;  %v1969_v0 = vmax.f32 %v1871_v6, %v1920_v12 }
 0x19b   :  { %v1971_v1 = vmax.f32 %v1873_v9, %v1922_v61  ;;  %2319 = vst.msk [vmem:[%s4000_s3 + $0xa8] sm:$0xf] %vm2276_vm3, %v2619_v59  ;;  %v2026_v45 = vadd.f32 %v3652_v46, %v1970_v60 }
 0x19c   :  { %v2073_v50 = vmax.f32 %v2024_v5, 0.0  ;;  %v2025_v51 = vadd.f32 %v3652_v46, %v1969_v0  ;;  %v2825_v52 = vpop.f32.mrb[96].mxu0 }
 0x19d   :  { %v2027_v62 = vadd.f32 %v3652_v46, %v1971_v1  ;;  %v2075_v21 = vmax.f32 %v2026_v45, 0.0  ;;  %v1876_v11 = vmax.f32 %v2825_v52, %v4101_v63  ;;  %v1428_v22 = vpop.f32.mrb[97].mxu0 }
 0x19e   :  { %v2620_v15 = vpack.c.bf16 %v2073_v50, %v2073_v50  ;;  %v2074_v12 = vmax.f32 %v2025_v51, 0.0  ;;  %v1874_v55 = vmax.f32 %v4102_v16, %v1428_v22  ;;  %v2826_v43 = vpop.f32.mrb[98].mxu0 }
 0x19f   :  { %v2076_v2 = vmax.f32 %v2027_v62, 0.0  ;;  %v2622_v17 = vpack.c.bf16 %v2075_v21, %v2075_v21  ;;  %v1925_v48 = vmax.f32 %v4105_v47, %v1876_v11  ;;  %v1877_v56 = vmax.f32 %v2826_v43, %v4106_v57  ;;  %v1431_v33 = vpop.f32.mrb[99].mxu0 }
 0x1a0   :  { %2320 = vst.msk [vmem:[%s4000_s3 + $0xac] sm:$0xf] %vm2276_vm3, %v2620_v15  ;;  %v2621_v58 = vpack.c.bf16 %v2074_v12, %v2074_v12  ;;  %v1972_v27 = vmax.f32 %v1874_v55, %v1923_v14  ;;  %v1875_v54 = vmax.f32 %v4107_v24, %v1431_v33 }
 0x1a1   :  { %v2623_v25 = vpack.c.bf16 %v2076_v2, %v2076_v2  ;;  %2322 = vst.msk [vmem:[%s4000_s3 + $0xb4] sm:$0xf] %vm2276_vm3, %v2622_v17  ;;  %v1981_v31 = vadd.f32 %v3652_v46, %v1925_v48  ;;  %v1926_v13 = vmax.f32 %v4110_v41, %v1877_v56 }
 0x1a2   :  { %2321 = vst.msk [vmem:[%s4000_s3 + $0xb0] sm:$0xf] %vm2276_vm3, %v2621_v58  ;;  %v2028_v14 = vadd.f32 %v3652_v46, %v1972_v27  ;;  %v1973_v23 = vmax.f32 %v1875_v54, %v1924_v36 }
 0x1a3   :  { %2323 = vst.msk [vmem:[%s4000_s3 + $0xb8] sm:$0xf] %vm2276_vm3, %v2623_v25  ;;  %v2030_v39 = vmax.f32 %v1981_v31, 0.0  ;;  %v1982_v3 = vadd.f32 %v3652_v46, %v1926_v13 }
 0x1a4   :  { %v2077_v4 = vmax.f32 %v2028_v14, 0.0  ;;  %v2029_v8 = vadd.f32 %v3652_v46, %v1973_v23 }
 0x1a5   :  { %v2577_v30 = vpack.c.bf16 %v2030_v39, %v2030_v39  ;;  %v2031_v7 = vmax.f32 %v1982_v3, 0.0 }
 0x1a6   :  { %v2624_v40 = vpack.c.bf16 %v2077_v4, %v2077_v4  ;;  %v2078_v35 = vmax.f32 %v2029_v8, 0.0 }
 0x1a7   :  { %2277 = vst.msk [vmem:[%s4000_s3] sm:$0xf] %vm2276_vm3, %v2577_v30  ;;  %v2578_v29 = vpack.c.bf16 %v2031_v7, %v2031_v7 }
 0x1a8   :  { %2324 = vst.msk [vmem:[%s4000_s3 + $0xbc] sm:$0xf] %vm2276_vm3, %v2624_v40  ;;  %v2625_v19 = vpack.c.bf16 %v2078_v35, %v2078_v35 }
 0x1a9   :  { %2278 = vst.msk [vmem:[%s4000_s3 + $0x4] sm:$0xf] %vm2276_vm3, %v2578_v29 }
 0x1aa   :  { %2325 = vst.msk [vmem:[%s4000_s3 + $0xc0] sm:$0xf] %vm2276_vm3, %v2625_v19 }

// kernel: autoencoder_forward.5
= control target key start
LH: loop header
LB: loop body
LE: loop exit
PB: predicated region body
PF: predicated region fallthrough
CT: control target
= control target key end

     0   :  { %v1056_v0 = vmov 0   ;;  %vm373_vm0 = vcmask 130048   ;;  %vm818_vm1 = vcmask 257024   ;;  %s1428_s1 = inlined_call_operand.vmem [shape: bf16[144,32], index: 1, kind: input, shape index: {}]   ;;  %s1429_s0 = inlined_call_operand.vmem [shape: bf16[416,144], index: 0, kind: input, shape index: {}]   ;;  %s1430_s2 = inlined_call_operand.vmem [shape: f32[1,32], index: 2, kind: input, shape index: {}]   ;;  %s1431_s3 = inlined_call_operand.vmem [shape: bf16[104,32], index: 3, kind: output, shape index: {}]  }
   0x1   :  { %452 = vmatprep.subr.bf16.mxu0 %v1056_v0  ;;  %950 = vmatprep.subr.bf16.mxu1 %v1056_v0  ;;  %v969_v1 = vld [vmem:[%s1428_s1] sm:$0xff]   ;;  %v970_v2 = vld [vmem:[%s1428_s1 + $0x8] sm:$0xff]   ;;  %v971_v3 = vld [vmem:[%s1428_s1 + $0x10] sm:$0xff]  }
   0x2   :  { %453 = vmatpush1.bf16.msra.mxu0 %v969_v1  ;;  %959 = vmatpush1.bf16.msra.mxu1 %v969_v1  ;;  %v972_v4 = vld [vmem:[%s1428_s1 + $0x18] sm:$0xff]   ;;  %v980_v5 = vld [vmem:[%s1429_s0 + $0x4] ss:$8 sps:$4 sm:$0xff]   ;;  %v975_v9 = vld [vmem:[%s1428_s1 + $0x30] sm:$0xff]  }
   0x3   :  { %454 = vmatprep.subr.bf16.mxu0 %v1056_v0  ;;  %951 = vmatprep.subr.bf16.mxu1 %v1056_v0  ;;  %v983_v6 = vld [vmem:[%s1429_s0 + $0xd4] ss:$8 sps:$4 sm:$0xff]   ;;  %v973_v7 = vld [vmem:[%s1428_s1 + $0x20] sm:$0xff]   ;;  %v974_v8 = vld [vmem:[%s1428_s1 + $0x28] sm:$0xff]  }
   0x4   :  { %897 = vmatprep.mubr.msk.bf16.mxu0 %vm373_vm0, %v980_v5  ;;  %910 = vmatprep.mubr.msk.bf16.mxu1 %vm373_vm0, %v983_v6  ;;  %v976_v10 = vld [vmem:[%s1428_s1 + $0x38] sm:$0xff]   ;;  %v977_v11 = vld [vmem:[%s1428_s1 + $0x40] sm:$0xff]  }
   0x5   :  { %v978_v12 = vld [vmem:[%s1429_s0] ss:$8 sps:$4 sm:$0xff]   ;;  %v981_v13 = vld [vmem:[%s1429_s0 + $0xd0] ss:$8 sps:$4 sm:$0xff]   ;;  %v984_v14 = vld [vmem:[%s1429_s0 + $0x14] ss:$8 sps:$4 sm:$0xff]  }
   0x6   :  { %455 = vmatpush1.bf16.msra.mxu0 %v970_v2  ;;  %960 = vmatpush1.bf16.msra.mxu1 %v970_v2  ;;  %v986_v15 = vld [vmem:[%s1429_s0 + $0xe4] ss:$8 sps:$4 sm:$0xff]   ;;  %v988_v16 = vld [vmem:[%s1429_s0 + $0x10] ss:$8 sps:$4 sm:$0xff]   ;;  %v989_v17 = vld [vmem:[%s1429_s0 + $0xe0] ss:$8 sps:$4 sm:$0xff]  }
   0x7   :  { %456 = vmatprep.subr.bf16.mxu0 %v1056_v0  ;;  %952 = vmatprep.subr.bf16.mxu1 %v1056_v0  ;;  %v990_v18 = vld [vmem:[%s1429_s0 + $0x24] ss:$8 sps:$4 sm:$0xff]   ;;  %v992_v19 = vld [vmem:[%s1429_s0 + $0xf4] ss:$8 sps:$4 sm:$0xff]   ;;  %v994_v20 = vld [vmem:[%s1429_s0 + $0x20] ss:$8 sps:$4 sm:$0xff]  }
   0x8   :  { %v995_v21 = vld [vmem:[%s1429_s0 + $0xf0] ss:$8 sps:$4 sm:$0xff]   ;;  %v996_v22 = vld [vmem:[%s1429_s0 + $0x34] ss:$8 sps:$4 sm:$0xff]   ;;  %v998_v23 = vld [vmem:[%s1429_s0 + $0x104] ss:$8 sps:$4 sm:$0xff]  }
   0x9   :  { %v1000_v24 = vld [vmem:[%s1429_s0 + $0x30] ss:$8 sps:$4 sm:$0xff]   ;;  %v1001_v25 = vld [vmem:[%s1429_s0 + $0x100] ss:$8 sps:$4 sm:$0xff]   ;;  %v1002_v26 = vld [vmem:[%s1429_s0 + $0x44] ss:$8 sps:$4 sm:$0xff]  }
   0xa   :  { %457 = vmatpush1.bf16.msra.mxu0 %v971_v3  ;;  %961 = vmatpush1.bf16.msra.mxu1 %v971_v3  ;;  %v1004_v27 = vld [vmem:[%s1429_s0 + $0x114] ss:$8 sps:$4 sm:$0xff]   ;;  %v1006_v28 = vld [vmem:[%s1429_s0 + $0x40] ss:$8 sps:$4 sm:$0xff]   ;;  %v1007_v29 = vld [vmem:[%s1429_s0 + $0x110] ss:$8 sps:$4 sm:$0xff]  }
   0xb   :  { %458 = vmatprep.subr.bf16.mxu0 %v1056_v0  ;;  %953 = vmatprep.subr.bf16.mxu1 %v1056_v0  ;;  %v1008_v30 = vld [vmem:[%s1429_s0 + $0x54] ss:$8 sps:$4 sm:$0xff]   ;;  %v1010_v31 = vld [vmem:[%s1429_s0 + $0x124] ss:$8 sps:$4 sm:$0xff]   ;;  %v1012_v32 = vld [vmem:[%s1429_s0 + $0x50] ss:$8 sps:$4 sm:$0xff]  }
   0xc   :  { %v1013_v33 = vld [vmem:[%s1429_s0 + $0x120] ss:$8 sps:$4 sm:$0xff]   ;;  %v1014_v34 = vld [vmem:[%s1429_s0 + $0x64] ss:$8 sps:$4 sm:$0xff]   ;;  %v1016_v35 = vld [vmem:[%s1429_s0 + $0x134] ss:$8 sps:$4 sm:$0xff]  }
   0xd   :  { %v1018_v36 = vld [vmem:[%s1429_s0 + $0x60] ss:$8 sps:$4 sm:$0xff]   ;;  %v1019_v37 = vld [vmem:[%s1429_s0 + $0x130] ss:$8 sps:$4 sm:$0xff]   ;;  %v1020_v38 = vld [vmem:[%s1429_s0 + $0x74] ss:$8 sps:$4 sm:$0xff]  }
   0xe   :  { %459 = vmatpush1.bf16.msra.mxu0 %v972_v4  ;;  %962 = vmatpush1.bf16.msra.mxu1 %v972_v4  ;;  %v1022_v39 = vld [vmem:[%s1429_s0 + $0x144] ss:$8 sps:$4 sm:$0xff]   ;;  %v1024_v40 = vld [vmem:[%s1429_s0 + $0x70] ss:$8 sps:$4 sm:$0xff]   ;;  %v1025_v41 = vld [vmem:[%s1429_s0 + $0x140] ss:$8 sps:$4 sm:$0xff]  }
   0xf   :  { %460 = vmatprep.subr.bf16.mxu0 %v1056_v0  ;;  %954 = vmatprep.subr.bf16.mxu1 %v1056_v0  ;;  %v1026_v42 = vld [vmem:[%s1429_s0 + $0x84] ss:$8 sps:$4 sm:$0xff]   ;;  %v1028_v43 = vld [vmem:[%s1429_s0 + $0x154] ss:$8 sps:$4 sm:$0xff]   ;;  %v1030_v44 = vld [vmem:[%s1429_s0 + $0x80] ss:$8 sps:$4 sm:$0xff]  }
  0x10   :  { %v1031_v45 = vld [vmem:[%s1429_s0 + $0x150] ss:$8 sps:$4 sm:$0xff]   ;;  %v1032_v46 = vld [vmem:[%s1429_s0 + $0x94] ss:$8 sps:$4 sm:$0xff]   ;;  %v1034_v47 = vld [vmem:[%s1429_s0 + $0x164] ss:$8 sps:$4 sm:$0xff]  }
  0x11   :  { %v1036_v48 = vld [vmem:[%s1429_s0 + $0x90] ss:$8 sps:$4 sm:$0xff]   ;;  %v1037_v49 = vld [vmem:[%s1429_s0 + $0x160] ss:$8 sps:$4 sm:$0xff]   ;;  %v1038_v50 = vld [vmem:[%s1429_s0 + $0xa4] ss:$8 sps:$4 sm:$0xff]  }
  0x12   :  { %461 = vmatpush1.bf16.msra.mxu0 %v973_v7  ;;  %963 = vmatpush1.bf16.msra.mxu1 %v973_v7  ;;  %v1040_v51 = vld [vmem:[%s1429_s0 + $0x174] ss:$8 sps:$4 sm:$0xff]   ;;  %v1042_v52 = vld [vmem:[%s1429_s0 + $0xa0] ss:$8 sps:$4 sm:$0xff]   ;;  %v1043_v53 = vld [vmem:[%s1429_s0 + $0x170] ss:$8 sps:$4 sm:$0xff]  }
  0x13   :  { %462 = vmatprep.subr.bf16.mxu0 %v1056_v0  ;;  %955 = vmatprep.subr.bf16.mxu1 %v1056_v0  ;;  %v1044_v54 = vld [vmem:[%s1429_s0 + $0xb4] ss:$8 sps:$4 sm:$0xff]   ;;  %v1046_v55 = vld [vmem:[%s1429_s0 + $0x184] ss:$8 sps:$4 sm:$0xff]   ;;  %v1048_v56 = vld [vmem:[%s1429_s0 + $0xb0] ss:$8 sps:$4 sm:$0xff]  }
  0x14   :  { %v1049_v57 = vld [vmem:[%s1429_s0 + $0x180] ss:$8 sps:$4 sm:$0xff]   ;;  %v1050_v58 = vld [vmem:[%s1429_s0 + $0xc4] ss:$8 sps:$4 sm:$0xff]   ;;  %v1052_v59 = vld [vmem:[%s1429_s0 + $0x194] ss:$8 sps:$4 sm:$0xff]  }
  0x15   :  { %v1054_v60 = vld [vmem:[%s1429_s0 + $0xc0] ss:$8 sps:$4 sm:$0xff]   ;;  %v1055_v61 = vld [vmem:[%s1429_s0 + $0x190] ss:$8 sps:$4 sm:$0xff]  }
  0x16   :  { %463 = vmatpush1.bf16.msra.mxu0 %v974_v8  ;;  %964 = vmatpush1.bf16.msra.mxu1 %v974_v8 }
  0x17   :  { %464 = vmatprep.subr.bf16.mxu0 %v1056_v0  ;;  %956 = vmatprep.subr.bf16.mxu1 %v1056_v0 }
  0x1a   :  { %465 = vmatpush1.bf16.msra.mxu0 %v975_v9  ;;  %965 = vmatpush1.bf16.msra.mxu1 %v975_v9 }
  0x1b   :  { %466 = vmatprep.subr.bf16.mxu0 %v1056_v0  ;;  %957 = vmatprep.subr.bf16.mxu1 %v1056_v0 }
  0x1e   :  { %467 = vmatpush1.bf16.msra.mxu0 %v976_v10  ;;  %966 = vmatpush1.bf16.msra.mxu1 %v976_v10 }
  0x1f   :  { %468 = vmatprep.subr.bf16.mxu0 %v1056_v0  ;;  %958 = vmatprep.subr.bf16.mxu1 %v1056_v0 }
  0x22   :  { %469 = vmatpush1.bf16.msra.mxu0 %v977_v11  ;;  %967 = vmatpush1.bf16.msra.mxu1 %v977_v11 }
  0x25   :  { %485 = vmatmul.mubr.bf16.vlgmr.msra.gmra.mrb[0].mxu0 %v978_v12  ;;  %589 = vmatmul.mubr.bf16.vlgmr.msra.gmra.mrb[0].mxu1 %v981_v13 }
  0x26   :  { %898 = vmatprep.mubr.msk.bf16.mxu0 %vm373_vm0, %v984_v14  ;;  %911 = vmatprep.mubr.msk.bf16.mxu1 %vm373_vm0, %v986_v15 }
  0x2d   :  { %493 = vmatmul.mubr.bf16.gmra.mrb[4].mxu0 %v988_v16  ;;  %597 = vmatmul.mubr.bf16.gmra.mrb[4].mxu1 %v989_v17 }
  0x2e   :  { %899 = vmatprep.mubr.msk.bf16.mxu0 %vm373_vm0, %v990_v18  ;;  %912 = vmatprep.mubr.msk.bf16.mxu1 %vm373_vm0, %v992_v19 }
  0x35   :  { %501 = vmatmul.mubr.bf16.gmra.mrb[8].mxu0 %v994_v20  ;;  %605 = vmatmul.mubr.bf16.gmra.mrb[8].mxu1 %v995_v21 }
  0x36   :  { %900 = vmatprep.mubr.msk.bf16.mxu0 %vm373_vm0, %v996_v22  ;;  %913 = vmatprep.mubr.msk.bf16.mxu1 %vm373_vm0, %v998_v23 }
  0x3d   :  { %509 = vmatmul.mubr.bf16.gmra.mrb[12].mxu0 %v1000_v24  ;;  %613 = vmatmul.mubr.bf16.gmra.mrb[12].mxu1 %v1001_v25 }
  0x3e   :  { %901 = vmatprep.mubr.msk.bf16.mxu0 %vm373_vm0, %v1002_v26  ;;  %914 = vmatprep.mubr.msk.bf16.mxu1 %vm373_vm0, %v1004_v27 }
  0x45   :  { %517 = vmatmul.mubr.bf16.gmra.mrb[16].mxu0 %v1006_v28  ;;  %621 = vmatmul.mubr.bf16.gmra.mrb[16].mxu1 %v1007_v29 }
  0x46   :  { %902 = vmatprep.mubr.msk.bf16.mxu0 %vm373_vm0, %v1008_v30  ;;  %915 = vmatprep.mubr.msk.bf16.mxu1 %vm373_vm0, %v1010_v31 }
  0x4d   :  { %525 = vmatmul.mubr.bf16.gmra.mrb[20].mxu0 %v1012_v32  ;;  %629 = vmatmul.mubr.bf16.gmra.mrb[20].mxu1 %v1013_v33 }
  0x4e   :  { %903 = vmatprep.mubr.msk.bf16.mxu0 %vm373_vm0, %v1014_v34  ;;  %916 = vmatprep.mubr.msk.bf16.mxu1 %vm373_vm0, %v1016_v35 }
  0x55   :  { %533 = vmatmul.mubr.bf16.gmra.mrb[24].mxu0 %v1018_v36  ;;  %637 = vmatmul.mubr.bf16.gmra.mrb[24].mxu1 %v1019_v37 }
  0x56   :  { %904 = vmatprep.mubr.msk.bf16.mxu0 %vm373_vm0, %v1020_v38  ;;  %917 = vmatprep.mubr.msk.bf16.mxu1 %vm373_vm0, %v1022_v39 }
  0x5d   :  { %541 = vmatmul.mubr.bf16.gmra.mrb[28].mxu0 %v1024_v40  ;;  %645 = vmatmul.mubr.bf16.gmra.mrb[28].mxu1 %v1025_v41 }
  0x5e   :  { %905 = vmatprep.mubr.msk.bf16.mxu0 %vm373_vm0, %v1026_v42  ;;  %918 = vmatprep.mubr.msk.bf16.mxu1 %vm373_vm0, %v1028_v43 }
  0x65   :  { %549 = vmatmul.mubr.bf16.gmra.mrb[32].mxu0 %v1030_v44  ;;  %653 = vmatmul.mubr.bf16.gmra.mrb[32].mxu1 %v1031_v45 }
  0x66   :  { %906 = vmatprep.mubr.msk.bf16.mxu0 %vm373_vm0, %v1032_v46  ;;  %919 = vmatprep.mubr.msk.bf16.mxu1 %vm373_vm0, %v1034_v47 }
  0x6d   :  { %557 = vmatmul.mubr.bf16.gmra.mrb[36].mxu0 %v1036_v48  ;;  %661 = vmatmul.mubr.bf16.gmra.mrb[36].mxu1 %v1037_v49 }
  0x6e   :  { %907 = vmatprep.mubr.msk.bf16.mxu0 %vm373_vm0, %v1038_v50  ;;  %920 = vmatprep.mubr.msk.bf16.mxu1 %vm373_vm0, %v1040_v51 }
  0x75   :  { %565 = vmatmul.mubr.bf16.gmra.mrb[40].mxu0 %v1042_v52  ;;  %669 = vmatmul.mubr.bf16.gmra.mrb[40].mxu1 %v1043_v53 }
  0x76   :  { %908 = vmatprep.mubr.msk.bf16.mxu0 %vm373_vm0, %v1044_v54  ;;  %921 = vmatprep.mubr.msk.bf16.mxu1 %vm373_vm0, %v1046_v55 }
  0x7d   :  { %573 = vmatmul.mubr.bf16.gmra.mrb[44].mxu0 %v1048_v56  ;;  %677 = vmatmul.mubr.bf16.gmra.mrb[44].mxu1 %v1049_v57  ;;  %v1337_v56 = vld [vmem:[%s1430_s2] ss:$0 sm:$0xff] }
  0x7e   :  { %909 = vmatprep.mubr.msk.bf16.mxu0 %vm373_vm0, %v1050_v58  ;;  %922 = vmatprep.mubr.msk.bf16.mxu1 %vm373_vm0, %v1052_v59 }
  0x85   :  { %581 = vmatmul.mubr.bf16.gmra.mrb[48].mxu0 %v1054_v60  ;;  %685 = vmatmul.mubr.bf16.gmra.mrb[48].mxu1 %v1055_v61 }
  0xf8   :  { %v486_v62 = vpop.f32.mrb[0].mxu0  ;;  %v590_v63 = vpop.f32.mrb[0].mxu1 }
  0xf9   :  { %v488_v0 = vpop.f32.mrb[1].mxu0  ;;  %v592_v1 = vpop.f32.mrb[1].mxu1 }
  0xfa   :  { %v1286_v2 = vpop.f32.mrb[2].mxu0  ;;  %v1288_v3 = vpop.f32.mrb[2].mxu1 }
  0xfb   :  { %v491_v4 = vpop.f32.mrb[3].mxu0  ;;  %v595_v5 = vpop.f32.mrb[3].mxu1 }
 0x100   :  { %v1290_v6 = vpop.f32.mrb[4].mxu0  ;;  %v1292_v7 = vpop.f32.mrb[4].mxu1 }
 0x101   :  { %v496_v8 = vpop.f32.mrb[5].mxu0  ;;  %v600_v9 = vpop.f32.mrb[5].mxu1 }
 0x102   :  { %v1294_v10 = vpop.f32.mrb[6].mxu0  ;;  %v1296_v11 = vpop.f32.mrb[6].mxu1 }
 0x103   :  { %v499_v12 = vpop.f32.mrb[7].mxu0  ;;  %v603_v13 = vpop.f32.mrb[7].mxu1 }
 0x108   :  { %v1298_v14 = vpop.f32.mrb[8].mxu0  ;;  %v1300_v15 = vpop.f32.mrb[8].mxu1 }
 0x109   :  { %v504_v16 = vpop.f32.mrb[9].mxu0  ;;  %v608_v17 = vpop.f32.mrb[9].mxu1 }
 0x10a   :  { %v1302_v18 = vpop.f32.mrb[10].mxu0  ;;  %v1304_v19 = vpop.f32.mrb[10].mxu1 }
 0x10b   :  { %v507_v20 = vpop.f32.mrb[11].mxu0  ;;  %v611_v21 = vpop.f32.mrb[11].mxu1 }
 0x110   :  { %v1306_v22 = vpop.f32.mrb[12].mxu0  ;;  %v1308_v23 = vpop.f32.mrb[12].mxu1 }
 0x111   :  { %v512_v24 = vpop.f32.mrb[13].mxu0  ;;  %v616_v25 = vpop.f32.mrb[13].mxu1 }
 0x112   :  { %v1310_v26 = vpop.f32.mrb[14].mxu0  ;;  %v1312_v27 = vpop.f32.mrb[14].mxu1 }
 0x113   :  { %v515_v28 = vpop.f32.mrb[15].mxu0  ;;  %v619_v29 = vpop.f32.mrb[15].mxu1 }
 0x118   :  { %v1314_v30 = vpop.f32.mrb[16].mxu0  ;;  %v1316_v31 = vpop.f32.mrb[16].mxu1 }
 0x119   :  { %v520_v32 = vpop.f32.mrb[17].mxu0  ;;  %v624_v33 = vpop.f32.mrb[17].mxu1 }
 0x11a   :  { %v1318_v34 = vpop.f32.mrb[18].mxu0  ;;  %v1320_v35 = vpop.f32.mrb[18].mxu1 }
 0x11b   :  { %v523_v36 = vpop.f32.mrb[19].mxu0  ;;  %v627_v37 = vpop.f32.mrb[19].mxu1 }
 0x120   :  { %v1322_v38 = vpop.f32.mrb[20].mxu0  ;;  %v1324_v39 = vpop.f32.mrb[20].mxu1 }
 0x121   :  { %v528_v40 = vpop.f32.mrb[21].mxu0  ;;  %v632_v41 = vpop.f32.mrb[21].mxu1 }
 0x122   :  { %v1326_v42 = vpop.f32.mrb[22].mxu0  ;;  %v1328_v43 = vpop.f32.mrb[22].mxu1 }
 0x123   :  { %v531_v44 = vpop.f32.mrb[23].mxu0  ;;  %v635_v45 = vpop.f32.mrb[23].mxu1 }
 0x128   :  { %v1330_v46 = vpop.f32.mrb[24].mxu0  ;;  %v1332_v47 = vpop.f32.mrb[24].mxu1 }
 0x129   :  { %v536_v48 = vpop.f32.mrb[25].mxu0  ;;  %v640_v49 = vpop.f32.mrb[25].mxu1 }
 0x12a   :  { %v537_v50 = vpop.f32.mrb[26].mxu0  ;;  %v641_v51 = vpop.f32.mrb[26].mxu1 }
 0x12b   :  { %v693_v52 = vmax.f32 %v486_v62, %v537_v50  ;;  %v706_v53 = vmax.f32 %v590_v63, %v641_v51  ;;  %v539_v54 = vpop.f32.mrb[27].mxu0  ;;  %v643_v55 = vpop.f32.mrb[27].mxu1 }
 0x12d   :  { %v719_v57 = vmax.f32 %v693_v52, %v706_v53 }
 0x12f   :  { %v739_v58 = vadd.f32 %v1337_v56, %v719_v57 }
 0x130   :  { %v542_v59 = vpop.f32.mrb[28].mxu0  ;;  %v646_v60 = vpop.f32.mrb[28].mxu1 }
 0x131   :  { %v752_v61 = vmax.f32 %v739_v58, 0.0  ;;  %v694_v0 = vmax.f32 %v1286_v2, %v542_v59  ;;  %v707_v1 = vmax.f32 %v1288_v3, %v646_v60  ;;  %v544_v4 = vpop.f32.mrb[29].mxu0  ;;  %v648_v62 = vpop.f32.mrb[29].mxu1 }
 0x132   :  { %v545_v63 = vpop.f32.mrb[30].mxu0  ;;  %v649_v5 = vpop.f32.mrb[30].mxu1 }
 0x133   :  { %v937_v8 = vpack.c.bf16 %v752_v61, %v752_v61  ;;  %v720_v9 = vmax.f32 %v694_v0, %v707_v1  ;;  %v695_v12 = vmax.f32 %v1290_v6, %v545_v63  ;;  %v708_v13 = vmax.f32 %v1292_v7, %v649_v5  ;;  %v547_v16 = vpop.f32.mrb[31].mxu0  ;;  %v651_v17 = vpop.f32.mrb[31].mxu1 }
 0x135   :  { %819 = vst.msk [vmem:[%s1431_s3] sm:$0xf] %vm818_vm1, %v937_v8  ;;  %v740_v2 = vadd.f32 %v1337_v56, %v720_v9  ;;  %v721_v3 = vmax.f32 %v695_v12, %v708_v13 }
 0x137   :  { %v753_v20 = vmax.f32 %v740_v2, 0.0  ;;  %v741_v21 = vadd.f32 %v1337_v56, %v721_v3 }
 0x138   :  { %v550_v24 = vpop.f32.mrb[32].mxu0  ;;  %v654_v25 = vpop.f32.mrb[32].mxu1 }
 0x139   :  { %v938_v28 = vpack.c.bf16 %v753_v20, %v753_v20  ;;  %v754_v29 = vmax.f32 %v741_v21, 0.0  ;;  %v696_v6 = vmax.f32 %v1294_v10, %v550_v24  ;;  %v709_v7 = vmax.f32 %v1296_v11, %v654_v25  ;;  %v552_v32 = vpop.f32.mrb[33].mxu0  ;;  %v656_v33 = vpop.f32.mrb[33].mxu1 }
 0x13a   :  { %v553_v36 = vpop.f32.mrb[34].mxu0  ;;  %v657_v37 = vpop.f32.mrb[34].mxu1 }
 0x13b   :  { %820 = vst.msk [vmem:[%s1431_s3 + $0x4] sm:$0xf] %vm818_vm1, %v938_v28  ;;  %v939_v40 = vpack.c.bf16 %v754_v29, %v754_v29  ;;  %v722_v41 = vmax.f32 %v696_v6, %v709_v7  ;;  %v697_v44 = vmax.f32 %v1298_v14, %v553_v36  ;;  %v710_v45 = vmax.f32 %v1300_v15, %v657_v37  ;;  %v555_v48 = vpop.f32.mrb[35].mxu0  ;;  %v659_v49 = vpop.f32.mrb[35].mxu1 }
 0x13d   :  { %821 = vst.msk [vmem:[%s1431_s3 + $0x8] sm:$0xf] %vm818_vm1, %v939_v40  ;;  %v742_v10 = vadd.f32 %v1337_v56, %v722_v41  ;;  %v723_v11 = vmax.f32 %v697_v44, %v710_v45 }
 0x13f   :  { %v755_v50 = vmax.f32 %v742_v10, 0.0  ;;  %v743_v51 = vadd.f32 %v1337_v56, %v723_v11 }
 0x140   :  { %v558_v52 = vpop.f32.mrb[36].mxu0  ;;  %v662_v53 = vpop.f32.mrb[36].mxu1 }
 0x141   :  { %v940_v54 = vpack.c.bf16 %v755_v50, %v755_v50  ;;  %v756_v55 = vmax.f32 %v743_v51, 0.0  ;;  %v698_v14 = vmax.f32 %v1302_v18, %v558_v52  ;;  %v711_v15 = vmax.f32 %v1304_v19, %v662_v53  ;;  %v560_v57 = vpop.f32.mrb[37].mxu0  ;;  %v664_v58 = vpop.f32.mrb[37].mxu1 }
 0x142   :  { %v561_v59 = vpop.f32.mrb[38].mxu0  ;;  %v665_v60 = vpop.f32.mrb[38].mxu1 }
 0x143   :  { %822 = vst.msk [vmem:[%s1431_s3 + $0xc] sm:$0xf] %vm818_vm1, %v940_v54  ;;  %v941_v61 = vpack.c.bf16 %v756_v55, %v756_v55  ;;  %v724_v0 = vmax.f32 %v698_v14, %v711_v15  ;;  %v699_v1 = vmax.f32 %v1306_v22, %v561_v59  ;;  %v712_v4 = vmax.f32 %v1308_v23, %v665_v60  ;;  %v563_v62 = vpop.f32.mrb[39].mxu0  ;;  %v667_v63 = vpop.f32.mrb[39].mxu1 }
 0x145   :  { %823 = vst.msk [vmem:[%s1431_s3 + $0x10] sm:$0xf] %vm818_vm1, %v941_v61  ;;  %v744_v18 = vadd.f32 %v1337_v56, %v724_v0  ;;  %v725_v19 = vmax.f32 %v699_v1, %v712_v4 }
 0x147   :  { %v757_v5 = vmax.f32 %v744_v18, 0.0  ;;  %v745_v8 = vadd.f32 %v1337_v56, %v725_v19 }
 0x148   :  { %v566_v9 = vpop.f32.mrb[40].mxu0  ;;  %v670_v12 = vpop.f32.mrb[40].mxu1 }
 0x149   :  { %v942_v13 = vpack.c.bf16 %v757_v5, %v757_v5  ;;  %v758_v16 = vmax.f32 %v745_v8, 0.0  ;;  %v700_v22 = vmax.f32 %v1310_v26, %v566_v9  ;;  %v713_v23 = vmax.f32 %v1312_v27, %v670_v12  ;;  %v568_v17 = vpop.f32.mrb[41].mxu0  ;;  %v672_v2 = vpop.f32.mrb[41].mxu1 }
 0x14a   :  { %v569_v3 = vpop.f32.mrb[42].mxu0  ;;  %v673_v20 = vpop.f32.mrb[42].mxu1 }
 0x14b   :  { %824 = vst.msk [vmem:[%s1431_s3 + $0x14] sm:$0xf] %vm818_vm1, %v942_v13  ;;  %v943_v21 = vpack.c.bf16 %v758_v16, %v758_v16  ;;  %v726_v24 = vmax.f32 %v700_v22, %v713_v23  ;;  %v701_v25 = vmax.f32 %v1314_v30, %v569_v3  ;;  %v714_v28 = vmax.f32 %v1316_v31, %v673_v20  ;;  %v571_v29 = vpop.f32.mrb[43].mxu0  ;;  %v675_v6 = vpop.f32.mrb[43].mxu1 }
 0x14d   :  { %825 = vst.msk [vmem:[%s1431_s3 + $0x18] sm:$0xf] %vm818_vm1, %v943_v21  ;;  %v746_v26 = vadd.f32 %v1337_v56, %v726_v24  ;;  %v727_v27 = vmax.f32 %v701_v25, %v714_v28 }
 0x14f   :  { %v759_v7 = vmax.f32 %v746_v26, 0.0  ;;  %v747_v32 = vadd.f32 %v1337_v56, %v727_v27 }
 0x150   :  { %v574_v33 = vpop.f32.mrb[44].mxu0  ;;  %v678_v36 = vpop.f32.mrb[44].mxu1 }
 0x151   :  { %v944_v37 = vpack.c.bf16 %v759_v7, %v759_v7  ;;  %v760_v40 = vmax.f32 %v747_v32, 0.0  ;;  %v702_v30 = vmax.f32 %v1318_v34, %v574_v33  ;;  %v715_v31 = vmax.f32 %v1320_v35, %v678_v36  ;;  %v576_v41 = vpop.f32.mrb[45].mxu0  ;;  %v680_v44 = vpop.f32.mrb[45].mxu1 }
 0x152   :  { %v577_v45 = vpop.f32.mrb[46].mxu0  ;;  %v681_v48 = vpop.f32.mrb[46].mxu1 }
 0x153   :  { %826 = vst.msk [vmem:[%s1431_s3 + $0x1c] sm:$0xf] %vm818_vm1, %v944_v37  ;;  %v945_v49 = vpack.c.bf16 %v760_v40, %v760_v40  ;;  %v728_v10 = vmax.f32 %v702_v30, %v715_v31  ;;  %v703_v11 = vmax.f32 %v1322_v38, %v577_v45  ;;  %v716_v50 = vmax.f32 %v1324_v39, %v681_v48  ;;  %v579_v51 = vpop.f32.mrb[47].mxu0  ;;  %v683_v52 = vpop.f32.mrb[47].mxu1 }
 0x155   :  { %827 = vst.msk [vmem:[%s1431_s3 + $0x20] sm:$0xf] %vm818_vm1, %v945_v49  ;;  %v748_v34 = vadd.f32 %v1337_v56, %v728_v10  ;;  %v729_v35 = vmax.f32 %v703_v11, %v716_v50 }
 0x157   :  { %v761_v53 = vmax.f32 %v748_v34, 0.0  ;;  %v749_v54 = vadd.f32 %v1337_v56, %v729_v35 }
 0x158   :  { %v582_v55 = vpop.f32.mrb[48].mxu0  ;;  %v686_v14 = vpop.f32.mrb[48].mxu1 }
 0x159   :  { %v946_v15 = vpack.c.bf16 %v761_v53, %v761_v53  ;;  %v762_v57 = vmax.f32 %v749_v54, 0.0  ;;  %v704_v38 = vmax.f32 %v1326_v42, %v582_v55  ;;  %v717_v39 = vmax.f32 %v1328_v43, %v686_v14  ;;  %v584_v58 = vpop.f32.mrb[49].mxu0  ;;  %v688_v59 = vpop.f32.mrb[49].mxu1 }
 0x15a   :  { %v585_v60 = vpop.f32.mrb[50].mxu0  ;;  %v689_v61 = vpop.f32.mrb[50].mxu1 }
 0x15b   :  { %828 = vst.msk [vmem:[%s1431_s3 + $0x24] sm:$0xf] %vm818_vm1, %v946_v15  ;;  %v947_v0 = vpack.c.bf16 %v762_v57, %v762_v57  ;;  %v730_v1 = vmax.f32 %v704_v38, %v717_v39  ;;  %v705_v4 = vmax.f32 %v1330_v46, %v585_v60  ;;  %v718_v62 = vmax.f32 %v1332_v47, %v689_v61  ;;  %v587_v63 = vpop.f32.mrb[51].mxu0  ;;  %v691_v18 = vpop.f32.mrb[51].mxu1 }
 0x15d   :  { %829 = vst.msk [vmem:[%s1431_s3 + $0x28] sm:$0xf] %vm818_vm1, %v947_v0  ;;  %v750_v42 = vadd.f32 %v1337_v56, %v730_v1  ;;  %v731_v43 = vmax.f32 %v705_v4, %v718_v62 }
 0x15f   :  { %v763_v19 = vmax.f32 %v750_v42, 0.0  ;;  %v751_v5 = vadd.f32 %v1337_v56, %v731_v43 }
 0x161   :  { %v948_v8 = vpack.c.bf16 %v763_v19, %v763_v19  ;;  %v764_v9 = vmax.f32 %v751_v5, 0.0 }
 0x163   :  { %830 = vst.msk [vmem:[%s1431_s3 + $0x2c] sm:$0xf] %vm818_vm1, %v948_v8  ;;  %v949_v46 = vpack.c.bf16 %v764_v9, %v764_v9 }
 0x165   :  { %831 = vst.msk [vmem:[%s1431_s3 + $0x30] sm:$0xf] %vm818_vm1, %v949_v46 }

// kernel: autoencoder_forward.6
= control target key start
LH: loop header
LB: loop body
LE: loop exit
PB: predicated region body
PF: predicated region fallthrough
CT: control target
= control target key end

     0   :  { %vm273_vm0 = vcmask 261120   ;;  %vm489_vm1 = vcmask 519168   ;;  %s826_s1 = inlined_call_operand.vmem [shape: bf16[288,64], index: 1, kind: input, shape index: {}]   ;;  %s827_s0 = inlined_call_operand.vmem [shape: bf16[96,288], index: 0, kind: input, shape index: {}]   ;;  %s828_s2 = inlined_call_operand.vmem [shape: f32[1,64], index: 2, kind: input, shape index: {}]   ;;  %s829_s3 = inlined_call_operand.vmem [shape: bf16[24,64], index: 3, kind: output, shape index: {}]  }
   0x1   :  { %v638_v0 = vld [vmem:[%s826_s1 + $0x40] sm:$0xff]   ;;  %v640_v2 = vld [vmem:[%s826_s1 + $0x48] sm:$0xff]   ;;  %v642_v4 = vld [vmem:[%s826_s1 + $0x50] sm:$0xff]  }
   0x2   :  { %v639_v1 = vld [vmem:[%s826_s1] sm:$0xff]   ;;  %546 = vmatprep.subr.bf16.mxu0 %v638_v0  ;;  %622 = vmatprep.subr.bf16.mxu1 %v638_v0  ;;  %v641_v3 = vld [vmem:[%s826_s1 + $0x8] sm:$0xff]   ;;  %v643_v5 = vld [vmem:[%s826_s1 + $0x10] sm:$0xff]  }
   0x3   :  { %547 = vmatpush3.bf16.msra.mxu0 %v639_v1  ;;  %630 = vmatpush3.bf16.msra.mxu1 %v639_v1  ;;  %v644_v6 = vld [vmem:[%s826_s1 + $0x58] sm:$0xff]   ;;  %v646_v8 = vld [vmem:[%s826_s1 + $0x60] sm:$0xff]   ;;  %v648_v10 = vld [vmem:[%s826_s1 + $0x68] sm:$0xff]  }
   0x4   :  { %548 = vmatprep.subr.bf16.mxu0 %v640_v2  ;;  %623 = vmatprep.subr.bf16.mxu1 %v640_v2  ;;  %v645_v7 = vld [vmem:[%s826_s1 + $0x18] sm:$0xff]   ;;  %v647_v9 = vld [vmem:[%s826_s1 + $0x20] sm:$0xff]   ;;  %v649_v13 = vld [vmem:[%s826_s1 + $0x28] sm:$0xff]  }
   0x5   :  { %v656_v11 = vld [vmem:[%s827_s0 + $0x4] ss:$12 sps:$4 sm:$0xff]   ;;  %v659_v12 = vld [vmem:[%s827_s0 + $0x7c] ss:$12 sps:$4 sm:$0xff]   ;;  %v654_v19 = vld [vmem:[%s827_s0] ss:$12 sps:$4 sm:$0xff]  }
   0x6   :  { %v650_v14 = vld [vmem:[%s826_s1 + $0x70] sm:$0xff]   ;;  %324 = vmatprep.mubr.bf16.mxu0 %v656_v11  ;;  %364 = vmatprep.mubr.bf16.mxu1 %v659_v12  ;;  %v652_v16 = vld [vmem:[%s826_s1 + $0x78] sm:$0xff]   ;;  %v660_v18 = vld [vmem:[%s826_s1 + $0x80] sm:$0xff]  }
   0x7   :  { %549 = vmatpush3.bf16.msra.mxu0 %v641_v3  ;;  %631 = vmatpush3.bf16.msra.mxu1 %v641_v3  ;;  %v651_v15 = vld [vmem:[%s826_s1 + $0x30] sm:$0xff]   ;;  %v653_v17 = vld [vmem:[%s826_s1 + $0x38] sm:$0xff]   ;;  %v661_v22 = vld [vmem:[%s826_s1 + $0x88] sm:$0xff]  }
   0x8   :  { %550 = vmatprep.subr.bf16.mxu0 %v642_v4  ;;  %624 = vmatprep.subr.bf16.mxu1 %v642_v4  ;;  %v657_v20 = vld [vmem:[%s827_s0 + $0x78] ss:$12 sps:$4 sm:$0xff]   ;;  %v662_v21 = vld [vmem:[%s827_s0 + $0x1c] ss:$12 sps:$4 sm:$0xff]   ;;  %v666_v25 = vld [vmem:[%s827_s0 + $0x20] ss:$12 sps:$4 sm:$0xff]  }
   0x9   :  { %v664_v23 = vld [vmem:[%s827_s0 + $0x8] ss:$12 sps:$4 sm:$0xff]   ;;  %v665_v24 = vld [vmem:[%s827_s0 + $0x18] ss:$12 sps:$4 sm:$0xff]   ;;  %v670_v28 = vld [vmem:[%s827_s0 + $0x30] ss:$12 sps:$4 sm:$0xff]  }
   0xa   :  { %v667_v26 = vld [vmem:[%s827_s0 + $0x34] ss:$12 sps:$4 sm:$0xff]   ;;  %v669_v27 = vld [vmem:[%s827_s0 + $0x38] ss:$12 sps:$4 sm:$0xff]   ;;  %v671_v29 = vld [vmem:[%s827_s0 + $0x50] ss:$12 sps:$4 sm:$0xff]  }
   0xb   :  { %551 = vmatpush3.bf16.msra.mxu0 %v643_v5  ;;  %632 = vmatpush3.bf16.msra.mxu1 %v643_v5  ;;  %v672_v30 = vld [vmem:[%s827_s0 + $0x4c] ss:$12 sps:$4 sm:$0xff]   ;;  %v674_v31 = vld [vmem:[%s827_s0 + $0x68] ss:$12 sps:$4 sm:$0xff]   ;;  %v677_v34 = vld [vmem:[%s827_s0 + $0x64] ss:$12 sps:$4 sm:$0xff]  }
   0xc   :  { %552 = vmatprep.subr.bf16.mxu0 %v644_v6  ;;  %625 = vmatprep.subr.bf16.mxu1 %v644_v6  ;;  %v675_v32 = vld [vmem:[%s827_s0 + $0x48] ss:$12 sps:$4 sm:$0xff]   ;;  %v676_v33 = vld [vmem:[%s827_s0 + $0x80] ss:$12 sps:$4 sm:$0xff]  }
   0xd   :  { %v679_v35 = vld [vmem:[%s827_s0 + $0x60] ss:$12 sps:$4 sm:$0xff]  }
   0xf   :  { %553 = vmatpush3.bf16.msra.mxu0 %v645_v7  ;;  %633 = vmatpush3.bf16.msra.mxu1 %v645_v7 }
  0x10   :  { %554 = vmatprep.subr.bf16.mxu0 %v646_v8  ;;  %626 = vmatprep.subr.bf16.mxu1 %v646_v8 }
  0x13   :  { %555 = vmatpush3.bf16.msra.mxu0 %v647_v9  ;;  %634 = vmatpush3.bf16.msra.mxu1 %v647_v9 }
  0x14   :  { %556 = vmatprep.subr.bf16.mxu0 %v648_v10  ;;  %627 = vmatprep.subr.bf16.mxu1 %v648_v10 }
  0x17   :  { %557 = vmatpush3.bf16.msra.mxu0 %v649_v13  ;;  %635 = vmatpush3.bf16.msra.mxu1 %v649_v13 }
  0x18   :  { %558 = vmatprep.subr.bf16.mxu0 %v650_v14  ;;  %628 = vmatprep.subr.bf16.mxu1 %v650_v14 }
  0x1b   :  { %559 = vmatpush3.bf16.msra.mxu0 %v651_v15  ;;  %636 = vmatpush3.bf16.msra.mxu1 %v651_v15 }
  0x1c   :  { %560 = vmatprep.subr.bf16.mxu0 %v652_v16  ;;  %629 = vmatprep.subr.bf16.mxu1 %v652_v16 }
  0x1f   :  { %561 = vmatpush3.bf16.msra.mxu0 %v653_v17  ;;  %637 = vmatpush3.bf16.msra.mxu1 %v653_v17 }
  0x20   :  { %606 = vmatprep.subr.bf16.mxu1 %v660_v18 }
  0x22   :  { %325 = vmatmul.mubr.bf16.vlgmr.msra.gmra.mrb[0].mxu0 %v654_v19  ;;  %365 = vmatmul.mubr.bf16.vlgmr.msra.gmra.mrb[0].mxu1 %v657_v20 }
  0x23   :  { %607 = vmatpush3.bf16.msra.mxu1 %v660_v18  ;;  %332 = vmatprep.mubr.bf16.mxu0 %v662_v21 }
  0x24   :  { %608 = vmatprep.subr.bf16.mxu1 %v661_v22  ;;  %610 = vmatprep.mubr.msk.bf16.mxu1 %vm273_vm0, %v664_v23 }
  0x27   :  { %609 = vmatpush3.bf16.msra.mxu1 %v661_v22 }
  0x2a   :  { %333 = vmatmul.mubr.bf16.gmra.mrb[4].mxu0 %v665_v24  ;;  %611 = vmatmul.mubr.msk.bf16.vlgmr.msra.gmra.mrb[4].mxu1 %vm273_vm0, %v666_v25 }
  0x2b   :  { %340 = vmatprep.mubr.bf16.mxu0 %v667_v26  ;;  %614 = vmatprep.mubr.msk.bf16.mxu1 %vm273_vm0, %v669_v27 }
  0x32   :  { %341 = vmatmul.mubr.bf16.gmra.mrb[8].mxu0 %v670_v28  ;;  %615 = vmatmul.mubr.msk.bf16.gmra.mrb[8].mxu1 %vm273_vm0, %v671_v29  ;;  %v539_v29 = vld [vmem:[%s828_s2] ss:$0 sm:$0xff] }
  0x33   :  { %348 = vmatprep.mubr.bf16.mxu0 %v672_v30  ;;  %618 = vmatprep.mubr.msk.bf16.mxu1 %vm273_vm0, %v674_v31 }
  0x3a   :  { %349 = vmatmul.mubr.bf16.gmra.mrb[12].mxu0 %v675_v32  ;;  %619 = vmatmul.mubr.msk.bf16.gmra.mrb[12].mxu1 %vm273_vm0, %v676_v33 }
  0x3b   :  { %356 = vmatprep.mubr.bf16.mxu0 %v677_v34 }
  0x42   :  { %357 = vmatmul.mubr.bf16.gmra.mrb[16].mxu0 %v679_v35 }
  0xf5   :  { %v562_v36 = vpop.f32.mrb[0].mxu0  ;;  %v592_v37 = vpop.f32.mrb[0].mxu1 }
  0xf6   :  { %v563_v38 = vpop.f32.mrb[1].mxu0  ;;  %v593_v39 = vpop.f32.mrb[1].mxu1 }
  0xf7   :  { %v564_v40 = vadd.f32 %v563_v38, %v562_v36  ;;  %v565_v41 = vpop.f32.mrb[2].mxu0  ;;  %v594_v42 = vadd.f32 %v593_v39, %v592_v37  ;;  %v595_v43 = vpop.f32.mrb[2].mxu1 }
  0xf8   :  { %v566_v44 = vpop.f32.mrb[3].mxu0  ;;  %v596_v45 = vpop.f32.mrb[3].mxu1 }
  0xf9   :  { %v567_v46 = vadd.f32 %v566_v44, %v565_v41  ;;  %v597_v47 = vadd.f32 %v596_v45, %v595_v43 }
  0xfd   :  { %v568_v48 = vpop.f32.mrb[4].mxu0  ;;  %v612_v49 = vpop.f32.mrb[4].mxu1 }
  0xfe   :  { %v569_v50 = vpop.f32.mrb[5].mxu0  ;;  %v407_v51 = vpop.f32.mrb[5].mxu1 }
  0xff   :  { %v570_v52 = vadd.f32 %v569_v50, %v568_v48  ;;  %v408_v53 = vadd.f32 %v564_v40, %v407_v51  ;;  %v571_v54 = vpop.f32.mrb[6].mxu0  ;;  %v613_v55 = vpop.f32.mrb[6].mxu1 }
 0x100   :  { %v572_v56 = vpop.f32.mrb[7].mxu0  ;;  %v410_v57 = vpop.f32.mrb[7].mxu1 }
 0x101   :  { %v416_v58 = vadd.f32 %v612_v49, %v570_v52  ;;  %v573_v59 = vadd.f32 %v572_v56, %v571_v54  ;;  %v411_v60 = vadd.f32 %v567_v46, %v410_v57 }
 0x103   :  { %v419_v61 = vadd.f32 %v613_v55, %v573_v59 }
 0x105   :  { %v454_v62 = vmax.f32 %v408_v53, %v419_v61  ;;  %v574_v63 = vpop.f32.mrb[8].mxu0  ;;  %v616_v0 = vpop.f32.mrb[8].mxu1 }
 0x106   :  { %v575_v1 = vpop.f32.mrb[9].mxu0  ;;  %v423_v2 = vpop.f32.mrb[9].mxu1 }
 0x107   :  { %v576_v3 = vadd.f32 %v575_v1, %v574_v63  ;;  %v577_v4 = vpop.f32.mrb[10].mxu0  ;;  %v617_v5 = vpop.f32.mrb[10].mxu1 }
 0x108   :  { %v578_v6 = vpop.f32.mrb[11].mxu0  ;;  %v426_v7 = vpop.f32.mrb[11].mxu1 }
 0x109   :  { %v579_v8 = vadd.f32 %v578_v6, %v577_v4  ;;  %v424_v9 = vadd.f32 %v576_v3, %v423_v2 }
 0x10b   :  { %v455_v10 = vmax.f32 %v411_v60, %v424_v9  ;;  %v427_v11 = vadd.f32 %v579_v8, %v426_v7 }
 0x10d   :  { %v456_v12 = vmax.f32 %v416_v58, %v427_v11  ;;  %v580_v13 = vpop.f32.mrb[12].mxu0  ;;  %v620_v14 = vpop.f32.mrb[12].mxu1 }
 0x10e   :  { %v448_v15 = vadd.f32 %v620_v14, %v594_v42  ;;  %v581_v16 = vpop.f32.mrb[13].mxu0  ;;  %v439_v17 = vpop.f32.mrb[13].mxu1 }
 0x10f   :  { %v582_v18 = vadd.f32 %v581_v16, %v580_v13  ;;  %v583_v19 = vpop.f32.mrb[14].mxu0  ;;  %v621_v20 = vpop.f32.mrb[14].mxu1 }
 0x110   :  { %v451_v21 = vadd.f32 %v621_v20, %v597_v47  ;;  %v584_v22 = vpop.f32.mrb[15].mxu0  ;;  %v442_v23 = vpop.f32.mrb[15].mxu1 }
 0x111   :  { %v432_v24 = vadd.f32 %v616_v0, %v582_v18  ;;  %v585_v25 = vadd.f32 %v584_v22, %v583_v19 }
 0x113   :  { %v435_v26 = vadd.f32 %v617_v5, %v585_v25 }
 0x115   :  { %v458_v27 = vmax.f32 %v435_v26, %v448_v15  ;;  %v586_v28 = vpop.f32.mrb[16].mxu0 }
 0x116   :  { %v587_v30 = vpop.f32.mrb[17].mxu0 }
 0x117   :  { %v461_v31 = vmax.f32 %v455_v10, %v458_v27  ;;  %v588_v32 = vadd.f32 %v587_v30, %v586_v28  ;;  %v589_v33 = vpop.f32.mrb[18].mxu0 }
 0x118   :  { %v590_v34 = vpop.f32.mrb[19].mxu0 }
 0x119   :  { %v471_v35 = vadd.f32 %v539_v29, %v461_v31  ;;  %v440_v36 = vadd.f32 %v588_v32, %v439_v17  ;;  %v591_v37 = vadd.f32 %v590_v34, %v589_v33 }
 0x11b   :  { %v474_v38 = vmax.f32 %v471_v35, 0.0  ;;  %v459_v39 = vmax.f32 %v440_v36, %v451_v21  ;;  %v443_v40 = vadd.f32 %v591_v37, %v442_v23 }
 0x11d   :  { %v544_v41 = vpack.c.bf16 %v474_v38, %v474_v38  ;;  %v462_v42 = vmax.f32 %v456_v12, %v459_v39  ;;  %v457_v43 = vmax.f32 %v432_v24, %v443_v40 }
 0x11f   :  { %491 = vst.msk [vmem:[%s829_s3 + $0x4] sm:$0xf] %vm489_vm1, %v544_v41  ;;  %v472_v44 = vadd.f32 %v539_v29, %v462_v42  ;;  %v460_v45 = vmax.f32 %v454_v62, %v457_v43 }
 0x121   :  { %v475_v46 = vmax.f32 %v472_v44, 0.0  ;;  %v470_v47 = vadd.f32 %v539_v29, %v460_v45 }
 0x123   :  { %v545_v48 = vpack.c.bf16 %v475_v46, %v475_v46  ;;  %v473_v49 = vmax.f32 %v470_v47, 0.0 }
 0x125   :  { %492 = vst.msk [vmem:[%s829_s3 + $0x8] sm:$0xf] %vm489_vm1, %v545_v48  ;;  %v543_v50 = vpack.c.bf16 %v473_v49, %v473_v49 }
 0x127   :  { %490 = vst.msk [vmem:[%s829_s3] sm:$0xf] %vm489_vm1, %v543_v50 }

// kernel: autoencoder_forward.7
= control target key start
LH: loop header
LB: loop body
LE: loop exit
PB: predicated region body
PF: predicated region fallthrough
CT: control target
= control target key end

     0   :  { %v820_v36 = vmov 0   ;;  %vm614_vm0 = vcmask 523264   ;;  %s1038_s1 = inlined_call_operand.vmem [shape: bf16[256,128], index: 1, kind: input, shape index: {}]   ;;  %s1039_s0 = inlined_call_operand.vmem [shape: bf16[32,256], index: 0, kind: input, shape index: {}]   ;;  %s1040_s3 = inlined_call_operand.vmem [shape: bf16[128,256], index: 3, kind: input, shape index: {}]   ;;  %s1041_s5 = inlined_call_operand.vmem [shape: bf16[256,64], index: 5, kind: input, shape index: {}]   ;;  %s1042_s2 = inlined_call_operand.vmem [shape: f32[1,128], index: 2, kind: input, shape index: {}]   ;;  %s1043_s4 = inlined_call_operand.vmem [shape: f32[1,256], index: 4, kind: input, shape index: {}]   ;;  %s1044_s6 = inlined_call_operand.vmem [shape: f32[1,64], index: 6, kind: input, shape index: {}]   ;;  %s1045_s7 = inlined_call_operand.vmem [shape: f32[32,64], index: 7, kind: output, shape index: {}]  }
   0x1   :  { %v750_v0 = vld [vmem:[%s1038_s1 + $0x40] sm:$0xff]   ;;  %v752_v2 = vld [vmem:[%s1038_s1 + $0x48] sm:$0xff]   ;;  %v754_v4 = vld [vmem:[%s1038_s1 + $0x50] sm:$0xff]   ;;  %381 = vmatprep.mubr.bf16.mxu1 %v820_v36 }
   0x2   :  { %v751_v1 = vld [vmem:[%s1038_s1] sm:$0xff]   ;;  %677 = vmatprep.subr.bf16.mxu0 %v750_v0  ;;  %v753_v3 = vld [vmem:[%s1038_s1 + $0x8] sm:$0xff]   ;;  %v755_v5 = vld [vmem:[%s1038_s1 + $0x10] sm:$0xff]  }
   0x3   :  { %678 = vmatpush3.bf16.msra.mxu0 %v751_v1  ;;  %v756_v6 = vld [vmem:[%s1038_s1 + $0x58] sm:$0xff]   ;;  %v758_v8 = vld [vmem:[%s1038_s1 + $0x60] sm:$0xff]   ;;  %v760_v10 = vld [vmem:[%s1038_s1 + $0x68] sm:$0xff]  }
   0x4   :  { %679 = vmatprep.subr.bf16.mxu0 %v752_v2  ;;  %v757_v7 = vld [vmem:[%s1038_s1 + $0x18] sm:$0xff]   ;;  %v759_v9 = vld [vmem:[%s1038_s1 + $0x20] sm:$0xff]   ;;  %v761_v12 = vld [vmem:[%s1038_s1 + $0x28] sm:$0xff]  }
   0x5   :  { %v768_v11 = vld [vmem:[%s1039_s0 + $0x4] ss:$8 sps:$4 sm:$0xff]   ;;  %v762_v13 = vld [vmem:[%s1038_s1 + $0x70] sm:$0xff]   ;;  %v774_v15 = vld [vmem:[%s1040_s3] ss:$8 sps:$4 sm:$0xff]  }
   0x6   :  { %218 = vmatprep.mubr.bf16.mxu0 %v768_v11  ;;  %v772_v14 = vld [vmem:[%s1040_s3 + $0x4] ss:$8 sps:$4 sm:$0xff]   ;;  %v775_v16 = vld [vmem:[%s1040_s3 + $0x14] ss:$8 sps:$4 sm:$0xff]   ;;  %v777_v17 = vld [vmem:[%s1040_s3 + $0x10] ss:$8 sps:$4 sm:$0xff]  }
   0x7   :  { %680 = vmatpush3.bf16.msra.mxu0 %v753_v3  ;;  %349 = vmatprep.subr.bf16.mxu1 %v772_v14  ;;  %v763_v18 = vld [vmem:[%s1038_s1 + $0x30] sm:$0xff]   ;;  %v778_v19 = vld [vmem:[%s1040_s3 + $0x24] ss:$8 sps:$4 sm:$0xff]   ;;  %v764_v20 = vld [vmem:[%s1038_s1 + $0x78] sm:$0xff]  }
   0x8   :  { %681 = vmatprep.subr.bf16.mxu0 %v754_v4  ;;  %350 = vmatpush1.bf16.msra.mxu1 %v774_v15  ;;  %v780_v21 = vld [vmem:[%s1040_s3 + $0x20] ss:$8 sps:$4 sm:$0xff]   ;;  %v765_v22 = vld [vmem:[%s1038_s1 + $0x38] sm:$0xff]   ;;  %v784_v27 = vld [vmem:[%s1040_s3 + $0x44] ss:$8 sps:$4 sm:$0xff]  }
   0x9   :  { %351 = vmatprep.subr.bf16.mxu1 %v775_v16  ;;  %v781_v23 = vld [vmem:[%s1040_s3 + $0x34] ss:$8 sps:$4 sm:$0xff]   ;;  %v766_v24 = vld [vmem:[%s1039_s0] ss:$8 sps:$4 sm:$0xff]   ;;  %v783_v25 = vld [vmem:[%s1040_s3 + $0x30] ss:$8 sps:$4 sm:$0xff]  }
   0xa   :  { %v769_v26 = vld [vmem:[%s1039_s0 + $0x14] ss:$8 sps:$4 sm:$0xff]   ;;  %v786_v28 = vld [vmem:[%s1040_s3 + $0x40] ss:$8 sps:$4 sm:$0xff]   ;;  %v771_v29 = vld [vmem:[%s1039_s0 + $0x10] ss:$8 sps:$4 sm:$0xff]  }
   0xb   :  { %682 = vmatpush3.bf16.msra.mxu0 %v755_v5  ;;  %v787_v30 = vld [vmem:[%s1040_s3 + $0x54] ss:$8 sps:$4 sm:$0xff]   ;;  %v789_v31 = vld [vmem:[%s1040_s3 + $0x50] ss:$8 sps:$4 sm:$0xff]   ;;  %v790_v32 = vld [vmem:[%s1040_s3 + $0x64] ss:$8 sps:$4 sm:$0xff]  }
   0xc   :  { %683 = vmatprep.subr.bf16.mxu0 %v756_v6  ;;  %352 = vmatpush1.bf16.msra.mxu1 %v777_v17  ;;  %v792_v33 = vld [vmem:[%s1040_s3 + $0x60] ss:$8 sps:$4 sm:$0xff]   ;;  %v793_v34 = vld [vmem:[%s1040_s3 + $0x74] ss:$8 sps:$4 sm:$0xff]   ;;  %v795_v35 = vld [vmem:[%s1040_s3 + $0x70] ss:$8 sps:$4 sm:$0xff]  }
   0xd   :  { %353 = vmatprep.subr.bf16.mxu1 %v778_v19  ;;  %v796_v37 = vld [vmem:[%s1041_s5 + $0x40] sm:$0xff]   ;;  %v798_v39 = vld [vmem:[%s1041_s5 + $0x48] sm:$0xff]   ;;  %v800_v41 = vld [vmem:[%s1041_s5 + $0x50] sm:$0xff]  }
   0xe   :  { %v797_v38 = vld [vmem:[%s1041_s5] sm:$0xff]   ;;  %v799_v40 = vld [vmem:[%s1041_s5 + $0x8] sm:$0xff]   ;;  %v801_v42 = vld [vmem:[%s1041_s5 + $0x10] sm:$0xff]  }
   0xf   :  { %684 = vmatpush3.bf16.msra.mxu0 %v757_v7  ;;  %v802_v43 = vld [vmem:[%s1041_s5 + $0x58] sm:$0xff]   ;;  %v804_v45 = vld [vmem:[%s1041_s5 + $0x60] sm:$0xff]   ;;  %v806_v47 = vld [vmem:[%s1041_s5 + $0x68] sm:$0xff]  }
  0x10   :  { %685 = vmatprep.subr.bf16.mxu0 %v758_v8  ;;  %354 = vmatpush1.bf16.msra.mxu1 %v780_v21  ;;  %v803_v44 = vld [vmem:[%s1041_s5 + $0x18] sm:$0xff]   ;;  %v805_v46 = vld [vmem:[%s1041_s5 + $0x20] sm:$0xff]   ;;  %v807_v7 = vld [vmem:[%s1041_s5 + $0x28] sm:$0xff]  }
  0x11   :  { %355 = vmatprep.subr.bf16.mxu1 %v781_v23  ;;  %v623_v49 = vld [vmem:[%s1042_s2] ss:$0 sm:$0xff]  ;;  %v808_v8 = vld [vmem:[%s1041_s5 + $0x70] sm:$0xff]   ;;  %v811_v11 = vld [vmem:[%s1041_s5 + $0x38] sm:$0xff]  }
  0x12   :  { %v257_v15 = vld [vmem:[%s1043_s4] sm:$0x3] }
  0x13   :  { %686 = vmatpush3.bf16.msra.mxu0 %v759_v9  ;;  %v809_v9 = vld [vmem:[%s1041_s5 + $0x30] sm:$0xff]  }
  0x14   :  { %687 = vmatprep.subr.bf16.mxu0 %v760_v10  ;;  %356 = vmatpush1.bf16.msra.mxu1 %v783_v25  ;;  %v810_v10 = vld [vmem:[%s1041_s5 + $0x78] sm:$0xff]  }
  0x15   :  { %357 = vmatprep.subr.bf16.mxu1 %v784_v27 }
  0x17   :  { %688 = vmatpush3.bf16.msra.mxu0 %v761_v12  ;;  %v259_v12 = vlaneseq }
  0x18   :  { %689 = vmatprep.subr.bf16.mxu0 %v762_v13  ;;  %358 = vmatpush1.bf16.msra.mxu1 %v786_v28 }
  0x19   :  { %359 = vmatprep.subr.bf16.mxu1 %v787_v30  ;;  %v260_v13 = vshrl.u32 %v259_v12, 7 }
  0x1b   :  { %690 = vmatpush3.bf16.msra.mxu0 %v763_v18  ;;  %v261_v14 = vsub.s32 0, %v260_v13  ;;  %v265_v16 = vsub.s32 1, %v260_v13 }
  0x1c   :  { %691 = vmatprep.subr.bf16.mxu0 %v764_v20  ;;  %360 = vmatpush1.bf16.msra.mxu1 %v789_v31 }
  0x1d   :  { %361 = vmatprep.subr.bf16.mxu1 %v790_v32  ;;  %v262_v17 = vrot.slane %v257_v15, %v261_v14  ;;  %v266_v18 = vrot.slane %v257_v15, %v265_v16 }
  0x1f   :  { %692 = vmatpush3.bf16.msra.mxu0 %v765_v22 }
  0x20   :  { %362 = vmatpush1.bf16.msra.mxu1 %v792_v33  ;;  %705 = vmatprep.subr.bf16.mxu0 %v796_v37 }
  0x21   :  { %363 = vmatprep.subr.bf16.mxu1 %v793_v34 }
  0x22   :  { %219 = vmatmul.mubr.bf16.vlgmr.msra.gmra.mrb[0].mxu0 %v766_v24 }
  0x23   :  { %226 = vmatprep.mubr.bf16.mxu0 %v769_v26  ;;  %706 = vmatpush3.bf16.msra.mxu0 %v797_v38 }
  0x24   :  { %364 = vmatpush1.bf16.msra.mxu1 %v795_v35  ;;  %707 = vmatprep.subr.bf16.mxu0 %v798_v39 }
  0x25   :  { %733 = vmatprep.subr.bf16.mxu1 %v796_v37 }
  0x27   :  { %708 = vmatpush3.bf16.msra.mxu0 %v799_v40 }
  0x28   :  { %709 = vmatprep.subr.bf16.mxu0 %v800_v41 }
  0x2a   :  { %227 = vmatmul.mubr.bf16.gmra.mrb[4].mxu0 %v771_v29 }
  0x2b   :  { %710 = vmatpush3.bf16.msra.mxu0 %v801_v42 }
  0x2c   :  { %711 = vmatprep.subr.bf16.mxu0 %v802_v43 }
  0x2f   :  { %712 = vmatpush3.bf16.msra.mxu0 %v803_v44 }
  0x30   :  { %713 = vmatprep.subr.bf16.mxu0 %v804_v45 }
  0x33   :  { %714 = vmatpush3.bf16.msra.mxu0 %v805_v46 }
  0x34   :  { %715 = vmatprep.subr.bf16.mxu0 %v806_v47 }
  0x37   :  { %716 = vmatpush3.bf16.msra.mxu0 %v807_v7 }
  0x38   :  { %717 = vmatprep.subr.bf16.mxu0 %v808_v8 }
  0x3b   :  { %718 = vmatpush3.bf16.msra.mxu0 %v809_v9 }
  0x3c   :  { %719 = vmatprep.subr.bf16.mxu0 %v810_v10 }
  0x3f   :  { %720 = vmatpush3.bf16.msra.mxu0 %v811_v11 }
  0xf5   :  { %v693_v48 = vpop.f32.mrb[0].mxu0 }
  0xf6   :  { %v694_v50 = vpop.f32.mrb[1].mxu0 }
  0xf7   :  { %v695_v51 = vadd.f32 %v694_v50, %v693_v48  ;;  %v696_v52 = vpop.f32.mrb[2].mxu0  ;;  %v660_v48 = vld [vmem:[%s1044_s6] ss:$0 sm:$0xff] }
  0xf8   :  { %v697_v53 = vpop.f32.mrb[3].mxu0 }
  0xf9   :  { %v221_v54 = vadd.f32 %v695_v51, %v623_v49  ;;  %v698_v55 = vadd.f32 %v697_v53, %v696_v52 }
  0xfb   :  { %v224_v56 = vadd.f32 %v698_v55, %v623_v49  ;;  %v235_v57 = vmax.f32 %v221_v54, 0.0 }
  0xfd   :  { %v236_v58 = vmax.f32 %v224_v56, 0.0  ;;  %v699_v59 = vpop.f32.mrb[4].mxu0 }
  0xfe   :  { %v700_v60 = vpop.f32.mrb[5].mxu0 }
  0xff   :  { %v701_v61 = vadd.f32 %v700_v60, %v699_v59  ;;  %v702_v62 = vpop.f32.mrb[6].mxu0  ;;  %v239_v63 = vpack.c.bf16 %v236_v58, %v235_v57 }
 0x100   :  { %v703_v0 = vpop.f32.mrb[7].mxu0 }
 0x101   :  { %v229_v1 = vadd.f32 %v701_v61, %v623_v49  ;;  %v704_v2 = vadd.f32 %v703_v0, %v702_v62  ;;  %382 = vmatmul.mubr.bf16.vlgmr.msra.gmra.mrb[0].mxu1 %v239_v63 }
 0x102   :  { %391 = vmatprep.mubr.bf16.mxu1 %v820_v36  ;;  %741 = vmatpush3.bf16.msra.mxu1 %v797_v38 }
 0x103   :  { %v232_v3 = vadd.f32 %v704_v2, %v623_v49  ;;  %734 = vmatprep.subr.bf16.mxu1 %v798_v39  ;;  %v237_v4 = vmax.f32 %v229_v1, 0.0 }
 0x105   :  { %v238_v5 = vmax.f32 %v232_v3, 0.0 }
 0x106   :  { %742 = vmatpush3.bf16.msra.mxu1 %v799_v40 }
 0x107   :  { %v240_v6 = vpack.c.bf16 %v238_v5, %v237_v4  ;;  %735 = vmatprep.subr.bf16.mxu1 %v800_v41 }
 0x109   :  { %392 = vmatmul.mubr.bf16.gmra.mrb[4].mxu1 %v240_v6 }
 0x10a   :  { %743 = vmatpush3.bf16.msra.mxu1 %v801_v42 }
 0x10b   :  { %736 = vmatprep.subr.bf16.mxu1 %v802_v43 }
 0x10e   :  { %744 = vmatpush3.bf16.msra.mxu1 %v803_v44 }
 0x10f   :  { %737 = vmatprep.subr.bf16.mxu1 %v804_v45 }
 0x112   :  { %745 = vmatpush3.bf16.msra.mxu1 %v805_v46 }
 0x113   :  { %738 = vmatprep.subr.bf16.mxu1 %v806_v47 }
 0x116   :  { %746 = vmatpush3.bf16.msra.mxu1 %v807_v7 }
 0x117   :  { %739 = vmatprep.subr.bf16.mxu1 %v808_v8 }
 0x11a   :  { %747 = vmatpush3.bf16.msra.mxu1 %v809_v9 }
 0x11b   :  { %740 = vmatprep.subr.bf16.mxu1 %v810_v10 }
 0x11e   :  { %748 = vmatpush3.bf16.msra.mxu1 %v811_v11 }
 0x1d4   :  { %v383_v19 = vpop.f32.mrb[0].mxu1 }
 0x1d5   :  { %v384_v20 = vadd.f32 %v383_v19, %v262_v17  ;;  %v385_v21 = vpop.f32.mrb[1].mxu1 }
 0x1d6   :  { %v386_v22 = vadd.f32 %v385_v21, %v266_v18  ;;  %v387_v23 = vpop.f32.mrb[2].mxu1 }
 0x1d7   :  { %v388_v24 = vadd.f32 %v387_v23, %v262_v17  ;;  %v389_v25 = vpop.f32.mrb[3].mxu1  ;;  %v402_v27 = vmax.f32 %v384_v20, 0.0 }
 0x1d8   :  { %v390_v26 = vadd.f32 %v389_v25, %v266_v18  ;;  %v403_v29 = vmax.f32 %v386_v22, 0.0 }
 0x1d9   :  { %v404_v28 = vmax.f32 %v388_v24, 0.0 }
 0x1da   :  { %v405_v30 = vmax.f32 %v390_v26, 0.0 }
 0x1db   :  { %v410_v31 = vpack.c.bf16 %v404_v28, %v402_v27 }
 0x1dc   :  { %v411_v32 = vpack.c.bf16 %v405_v30, %v403_v29  ;;  %v393_v33 = vpop.f32.mrb[4].mxu1 }
 0x1dd   :  { %v394_v34 = vadd.f32 %v393_v33, %v262_v17  ;;  %v395_v35 = vpop.f32.mrb[5].mxu1 }
 0x1de   :  { %v396_v36 = vadd.f32 %v395_v35, %v266_v18  ;;  %v397_v37 = vpop.f32.mrb[6].mxu1  ;;  %581 = vmatprep.mubr.bf16.mxu0 %v411_v32 }
 0x1df   :  { %v398_v38 = vadd.f32 %v397_v37, %v262_v17  ;;  %v399_v39 = vpop.f32.mrb[7].mxu1  ;;  %582 = vmatmul.mubr.bf16.vlgmr.msra.gmra.mrb[8].mxu0 %v410_v31  ;;  %v406_v41 = vmax.f32 %v394_v34, 0.0 }
 0x1e0   :  { %v400_v40 = vadd.f32 %v399_v39, %v266_v18  ;;  %v407_v43 = vmax.f32 %v396_v36, 0.0 }
 0x1e1   :  { %v408_v42 = vmax.f32 %v398_v38, 0.0 }
 0x1e2   :  { %v409_v44 = vmax.f32 %v400_v40, 0.0 }
 0x1e3   :  { %v412_v45 = vpack.c.bf16 %v408_v42, %v406_v41 }
 0x1e4   :  { %v413_v46 = vpack.c.bf16 %v409_v44, %v407_v43 }
 0x1e6   :  { %589 = vmatprep.mubr.bf16.mxu1 %v413_v46 }
 0x1e7   :  { %590 = vmatmul.mubr.bf16.vlgmr.msra.gmra.mrb[8].mxu1 %v412_v45 }
 0x2b2   :  { %v721_v47 = vpop.f32.mrb[8].mxu0 }
 0x2b3   :  { %v722_v49 = vpop.f32.mrb[9].mxu0 }
 0x2b4   :  { %v723_v50 = vadd.f32 %v722_v49, %v721_v47  ;;  %v724_v51 = vpop.f32.mrb[10].mxu0 }
 0x2b5   :  { %v725_v52 = vpop.f32.mrb[11].mxu0 }
 0x2b6   :  { %v584_v53 = vadd.f32 %v723_v50, %v660_v48  ;;  %v726_v54 = vadd.f32 %v725_v52, %v724_v51 }
 0x2b8   :  { %v598_v55 = vmul.f32 0.5, %v584_v53  ;;  %v587_v56 = vadd.f32 %v726_v54, %v660_v48 }
 0x2ba   :  { %812 = vtanh.f32 %v598_v55  ;;  %v599_v57 = vmul.f32 0.5, %v587_v56  ;;  %v727_v58 = vpop.f32.mrb[8].mxu1 }
 0x2bb   :  { %v728_v59 = vpop.f32.mrb[9].mxu1 }
 0x2bc   :  { %814 = vtanh.f32 %v599_v57  ;;  %v729_v60 = vadd.f32 %v728_v59, %v727_v58  ;;  %v730_v61 = vpop.f32.mrb[10].mxu1 }
 0x2bd   :  { %v731_v62 = vpop.f32.mrb[11].mxu1 }
 0x2be   :  { %v592_v63 = vadd.f32 %v729_v60, %v660_v48  ;;  %v732_v0 = vadd.f32 %v731_v62, %v730_v61 }
 0x2c0   :  { %v600_v1 = vmul.f32 0.5, %v592_v63  ;;  %v595_v2 = vadd.f32 %v732_v0, %v660_v48 }
 0x2c2   :  { %816 = vtanh.f32 %v600_v1  ;;  %v601_v3 = vmul.f32 0.5, %v595_v2 }
 0x2c4   :  { %v813_v4 = vpop.eup %812  ;;  %818 = vtanh.f32 %v601_v3 }
 0x2c5   :  { %v606_v5 = vmul.f32 0.5, %v813_v4 }
 0x2c6   :  { %v815_v6 = vpop.eup %814 }
 0x2c7   :  { %v610_v7 = vadd.f32 0.5, %v606_v5  ;;  %v607_v8 = vmul.f32 0.5, %v815_v6 }
 0x2c9   :  { %615 = vst.msk [vmem:[%s1045_s7] sm:$0xff] %vm614_vm0, %v610_v7  ;;  %v611_v9 = vadd.f32 0.5, %v607_v8 }
 0x2cb   :  { %616 = vst.msk [vmem:[%s1045_s7 + $0x8] sm:$0xff] %vm614_vm0, %v611_v9 }
 0x2cc   :  { %v817_v10 = vpop.eup %816 }
 0x2cd   :  { %v608_v11 = vmul.f32 0.5, %v817_v10 }
 0x2ce   :  { %v819_v12 = vpop.eup %818 }
 0x2cf   :  { %v612_v13 = vadd.f32 0.5, %v608_v11  ;;  %v609_v14 = vmul.f32 0.5, %v819_v12 }
 0x2d1   :  { %617 = vst.msk [vmem:[%s1045_s7 + $0x10] sm:$0xff] %vm614_vm0, %v612_v13  ;;  %v613_v15 = vadd.f32 0.5, %v609_v14 }
 0x2d3   :  { %618 = vst.msk [vmem:[%s1045_s7 + $0x18] sm:$0xff] %vm614_vm0, %v613_v15 }

</bundles_post_ra>
